<compile_context>
chip_gen: v7x
topology: tpu7x:2x2x1
jax: 0.10.0
libtpu: 0.0.40
codegen_flags: <defaults>
</compile_context>

<pallas_src>
import functools

import jax
import jax.numpy as jnp
from jax.experimental import pallas as pl
from jax.experimental.pallas import tpu as pltpu


def _round_up(x, m):
    return (x + m - 1) // m * m


# ----------------------------------------------------------------------------
# Pallas kernel: tiled GEMM (bf16 x bf16 -> f32 accumulated in the output
# tile) fused with per-column affine (folded batchnorm + bias) + activation.
# ----------------------------------------------------------------------------
def _gemm_bn_act_kernel(x_ref, w_ref, s_ref, t_ref, o_ref, *, act):
    k = pl.program_id(2)

    @pl.when(k == 0)
    def _():
        o_ref[...] = jnp.zeros_like(o_ref)

    o_ref[...] += jnp.dot(x_ref[...], w_ref[...],
                          preferred_element_type=jnp.float32)

    @pl.when(k == pl.num_programs(2) - 1)
    def _():
        y = o_ref[...] * s_ref[...] + t_ref[...]   # folded bn affine (+bias)
        if act == "relu":
            y = jnp.maximum(y, 0.0)
        elif act == "sigmoid":
            y = jax.nn.sigmoid(y)
        o_ref[...] = y


def fused_gemm_bn_act(x, w, scale, shift, act):
    """act((x @ w) * scale + shift); scale/shift are per output column."""
    M, K = x.shape
    _, N = w.shape

    # ---- tile selection (bf16 operands, f32 accumulation) -------------------
    tm = min(512, _round_up(M, 16))          # 16: bf16 sublane packing
    Mp = _round_up(M, tm)
    Kp = _round_up(K, 128)
    tk = 256 if Kp % 256 == 0 else 128       # feed the 256-wide v6e/v7x MXU
    tn = min(512, _round_up(N, 128))
    Np = _round_up(N, tn)

    xb = x.astype(jnp.bfloat16)
    wb = w.astype(jnp.bfloat16)
    if (Mp, Kp) != (M, K):
        xb = jnp.pad(xb, ((0, Mp - M), (0, Kp - K)))
    if (Kp, Np) != (K, N):
        wb = jnp.pad(wb, ((0, Kp - K), (0, Np - N)))
    sp = jnp.pad(scale.astype(jnp.float32), (0, Np - N)).reshape(1, Np)
    tp = jnp.pad(shift.astype(jnp.float32), (0, Np - N)).reshape(1, Np)

    # Explicit VMEM budget: double-buffered x/w tiles + resident f32 out tile.
    tile_bytes = 2 * (tm * tk * 2 + tk * tn * 2 + tm * tn * 4 + 2 * tn * 4)
    vmem_limit = int(min(max(4 * tile_bytes, 8 << 20), 32 << 20))

    kernel = functools.partial(_gemm_bn_act_kernel, act=act)
    out = pl.pallas_call(
        kernel,
        out_shape=jax.ShapeDtypeStruct((Mp, Np), jnp.float32),
        grid=(Mp // tm, Np // tn, Kp // tk),
        in_specs=[
            pl.BlockSpec((tm, tk), lambda m, n, k: (m, k)),
            pl.BlockSpec((tk, tn), lambda m, n, k: (k, n)),
            pl.BlockSpec((1, tn), lambda m, n, k: (0, n)),
            pl.BlockSpec((1, tn), lambda m, n, k: (0, n)),
        ],
        out_specs=pl.BlockSpec((tm, tn), lambda m, n, k: (m, n)),
        compiler_params=pltpu.CompilerParams(
            dimension_semantics=("parallel", "parallel", "arbitrary"),
            vmem_limit_bytes=vmem_limit),
    )(xb, wb, sp, tp)
    if (Mp, Np) != (M, N):
        out = out[:M, :N]
    return out


# ----------------------------------------------------------------------------
# Glue: deconv layers as im2col -> fused GEMM
# ----------------------------------------------------------------------------
def _fold_bn(bn, eps=1e-5):
    scale = bn["gamma"] / jnp.sqrt(bn["var"] + eps)
    shift = bn["beta"] - bn["mean"] * scale
    return scale, shift


def _deconv_s2k4_bn_act(x, w_t, bias, scale, shift, act):
    """ConvTranspose2d(k=4, stride=2, padding=1) + folded BN + activation via
    sub-pixel phase decomposition (four 2x2 stride-1 convs, no zero dilation).
    x: (B, H, W, Cin) NHWC; w_t: (Cin, Cout, 4, 4) PyTorch layout."""
    B, H, W, Cin = x.shape
    Cout = w_t.shape[1]
    shift_b = bias * scale + shift           # fold conv bias into bn shift
    xp = jnp.pad(x, ((0, 0), (1, 1), (1, 1), (0, 0)))
    phase_rows = []
    for py in range(2):
        row = []
        for px in range(2):
            win = xp[:, py:py + H + 1, px:px + W + 1, :]
            cols, taps = [], []
            for dy in range(2):
                for dx in range(2):
                    cols.append(win[:, dy:dy + H, dx:dx + W, :])
                    taps.append(w_t[:, :, 3 - py - 2 * dy, 3 - px - 2 * dx])
            patches = jnp.concatenate(cols, axis=-1).reshape(B * H * W, 4 * Cin)
            wm = jnp.stack(taps, axis=0).reshape(4 * Cin, Cout)
            y = fused_gemm_bn_act(patches, wm, scale, shift_b, act)
            row.append(y.reshape(B, H, W, Cout))
        phase_rows.append(jnp.stack(row, axis=0))
    stacked = jnp.stack(phase_rows, axis=0)          # (py, px, B, H, W, C)
    out = stacked.transpose(2, 3, 0, 4, 1, 5).reshape(B, 2 * H, 2 * W, Cout)
    return out


def _deconv_s1_bn_act(x, w_t, bias, scale, shift, act, padding):
    """Stride-1 ConvTranspose2d == regular conv with flipped taps."""
    k = w_t.shape[2]
    p = k - 1 - padding
    B, H, W, Cin = x.shape
    Cout = w_t.shape[1]
    xp = jnp.pad(x, ((0, 0), (p, p), (p, p), (0, 0)))
    Ho, Wo = H + 2 * p - k + 1, W + 2 * p - k + 1
    cols = [xp[:, i:i + Ho, j:j + Wo, :] for i in range(k) for j in range(k)]
    patches = jnp.concatenate(cols, axis=-1).reshape(B * Ho * Wo, k * k * Cin)
    w_conv = jnp.flip(w_t, axis=(2, 3)).transpose(2, 3, 0, 1).reshape(k * k * Cin, Cout)
    shift_b = bias * scale + shift
    y = fused_gemm_bn_act(patches, w_conv, scale, shift_b, act)
    return y.reshape(B, Ho, Wo, Cout)


# ----------------------------------------------------------------------------
# Parameter init (deterministic, synthetic) and forward pass
# ----------------------------------------------------------------------------
def init_params(key, z_size, image_size, image_channel_size, channel_size):
    cs = channel_size
    H0 = image_size // 8
    F = H0 * H0 * cs * 8
    ks = jax.random.split(key, 16)

    def bn(k, c):
        k1, k2, k3, k4 = jax.random.split(k, 4)
        return dict(
            gamma=jax.random.uniform(k1, (c,), jnp.float32, 0.5, 1.5),
            beta=0.1 * jax.random.normal(k2, (c,), jnp.float32),
            mean=0.1 * jax.random.normal(k3, (c,), jnp.float32),
            var=jax.random.uniform(k4, (c,), jnp.float32, 0.5, 1.5),
        )

    params = {
        # fc weight stored as (z_size, F) == PyTorch weight.T
        "fc_w": 0.05 * jax.random.normal(ks[0], (z_size, F), jnp.float32),
        "fc_b": 0.05 * jax.random.normal(ks[1], (F,), jnp.float32),
        "bn0": bn(ks[2], cs * 8),
        # ConvTranspose2d weights in PyTorch layout (Cin, Cout, k, k)
        "w1": 0.05 * jax.random.normal(ks[3], (cs * 8, cs * 4, 4, 4), jnp.float32),
        "b1": 0.05 * jax.random.normal(ks[4], (cs * 4,), jnp.float32),
        "bn1": bn(ks[5], cs * 4),
        "w2": 0.05 * jax.random.normal(ks[6], (cs * 4, cs * 2, 4, 4), jnp.float32),
        "b2": 0.05 * jax.random.normal(ks[7], (cs * 2,), jnp.float32),
        "bn2": bn(ks[8], cs * 2),
        "w3": 0.05 * jax.random.normal(ks[9], (cs * 2, cs, 4, 4), jnp.float32),
        "b3": 0.05 * jax.random.normal(ks[10], (cs,), jnp.float32),
        "bn3": bn(ks[11], cs),
        "w4": 0.05 * jax.random.normal(ks[12], (cs, image_channel_size, 3, 3), jnp.float32),
        "b4": 0.05 * jax.random.normal(ks[13], (image_channel_size,), jnp.float32),
    }
    return params


@functools.partial(jax.jit, static_argnums=(2, 3, 4))
def generator_forward(params, z, image_size, image_channel_size, channel_size):
    B = z.shape[0]
    cs = channel_size
    H0 = image_size // 8
    C8 = cs * 8

    # fc + bn0 + relu (bn0 params broadcast over the H0*W0 positions each
    # channel occupies after the PyTorch .view(B, C8, H0, W0))
    s0, t0 = _fold_bn(params["bn0"])
    scale_fc = jnp.repeat(s0, H0 * H0)
    shift_fc = params["fc_b"] * scale_fc + jnp.repeat(t0, H0 * H0)
    g = fused_gemm_bn_act(z, params["fc_w"], scale_fc, shift_fc, "relu")
    g = g.reshape(B, C8, H0, H0).transpose(0, 2, 3, 1)   # NCHW view -> NHWC

    s1, t1 = _fold_bn(params["bn1"])
    g = _deconv_s2k4_bn_act(g, params["w1"], params["b1"], s1, t1, "relu")
    s2, t2 = _fold_bn(params["bn2"])
    g = _deconv_s2k4_bn_act(g, params["w2"], params["b2"], s2, t2, "relu")
    s3, t3 = _fold_bn(params["bn3"])
    g = _deconv_s2k4_bn_act(g, params["w3"], params["b3"], s3, t3, "relu")

    # final deconv: no batchnorm (scale=1, shift=0 -> shift folds to bias), sigmoid
    ones = jnp.ones((image_channel_size,), jnp.float32)
    zeros = jnp.zeros((image_channel_size,), jnp.float32)
    g = _deconv_s1_bn_act(g, params["w4"], params["b4"], ones, zeros,
                          "sigmoid", padding=1)
    return g.transpose(0, 3, 1, 2)   # NHWC -> NCHW (PyTorch output layout)


if __name__ == "__main__":
    z_size, image_size, image_channel_size, channel_size = 32, 16, 3, 4
    batch = 2

    key = jax.random.PRNGKey(0)
    k_params, k_z = jax.random.split(key)
    params = init_params(k_params, z_size, image_size,
                         image_channel_size, channel_size)
    z = jax.random.normal(k_z, (batch, z_size), jnp.float32)

    out = generator_forward(params, z, image_size,
                            image_channel_size, channel_size)
    out = jax.block_until_ready(out)

    assert out.shape == (batch, image_channel_size, image_size, image_size)
    assert bool(jnp.all(jnp.isfinite(out)))
    assert bool(jnp.all((out >= 0.0) & (out <= 1.0)))  # sigmoid range
    print("KERNEL_OK")
</pallas_src>

<mosaic_0001>
module attributes {stable_mosaic.version = 11 : i64} {
  func.func @_gemm_bn_act_kernel(%arg0: i32, %arg1: i32, %arg2: i32, %arg3: memref<16x128xbf16, #tpu.memory_space<vmem>>, %arg4: memref<128x128xbf16, #tpu.memory_space<vmem>>, %arg5: memref<1x128xf32, #tpu.memory_space<vmem>>, %arg6: memref<1x128xf32, #tpu.memory_space<vmem>>, %arg7: memref<16x128xf32, #tpu.memory_space<vmem>>) attributes {dimension_semantics = [#tpu.dimension_semantics<parallel>, #tpu.dimension_semantics<parallel>, #tpu.dimension_semantics<arbitrary>], iteration_bounds = array<i64: 1, 1, 1>, scalar_prefetch = 0 : i64, scratch_operands = 0 : i64, tpu.core_type = #tpu.core_type<tc>, window_params = [{transform_indices = @transform_0, window_bounds = array<i64: 16, 128>}, {transform_indices = @transform_1, window_bounds = array<i64: 128, 128>}, {transform_indices = @transform_2, window_bounds = array<i64: 1, 128>}, {transform_indices = @transform_3, window_bounds = array<i64: 1, 128>}, {transform_indices = @transform_4, window_bounds = array<i64: 16, 128>}]} {
    %c0_i32 = arith.constant 0 : i32
    %0 = arith.cmpi eq, %arg2, %c0_i32 : i32
    %1 = arith.extui %0 : i1 to i32
    %c0_i32_0 = arith.constant 0 : i32
    %2 = arith.cmpi ne, %1, %c0_i32_0 : i32
    scf.if %2 {
      %cst_10 = arith.constant 0.000000e+00 : f32
      %12 = vector.broadcast %cst_10 : f32 to vector<16x128xf32>
      %c0_11 = arith.constant 0 : index
      %c0_12 = arith.constant 0 : index
      %13 = vector.load %arg7[%c0_11, %c0_12] : memref<16x128xf32, #tpu.memory_space<vmem>>, vector<16x128xf32>
      tpu.vector_store %arg7[%c0_11, %c0_12], %12 {strides = array<i32>} : memref<16x128xf32, #tpu.memory_space<vmem>>, vector<16x128xf32>,
    } else {
    }
    %c0 = arith.constant 0 : index
    %c0_1 = arith.constant 0 : index
    %3 = vector.load %arg7[%c0, %c0_1] : memref<16x128xf32, #tpu.memory_space<vmem>>, vector<16x128xf32>
    %c0_2 = arith.constant 0 : index
    %c0_3 = arith.constant 0 : index
    %4 = vector.load %arg3[%c0_2, %c0_3] : memref<16x128xbf16, #tpu.memory_space<vmem>>, vector<16x128xbf16>
    %c0_4 = arith.constant 0 : index
    %c0_5 = arith.constant 0 : index
    %5 = vector.load %arg4[%c0_4, %c0_5] : memref<128x128xbf16, #tpu.memory_space<vmem>>, vector<128x128xbf16>
    %cst = arith.constant dense<0.000000e+00> : vector<16x128xf32>
    %6 = tpu.matmul %4, %5, %cst {dimension_numbers = #tpu.dot_dimension_numbers<[1], [0], [0], [1], [0, 0, 1, 1], [], []>} : vector<16x128xbf16>, vector<128x128xbf16>, vector<16x128xf32> -> vector<16x128xf32>
    %7 = arith.addf %3, %6 : vector<16x128xf32>
    %c0_6 = arith.constant 0 : index
    %c0_7 = arith.constant 0 : index
    %8 = vector.load %arg7[%c0_6, %c0_7] : memref<16x128xf32, #tpu.memory_space<vmem>>, vector<16x128xf32>
    tpu.vector_store %arg7[%c0_6, %c0_7], %7 {strides = array<i32>} : memref<16x128xf32, #tpu.memory_space<vmem>>, vector<16x128xf32>,
    %c0_i32_8 = arith.constant 0 : i32
    %9 = arith.cmpi eq, %arg2, %c0_i32_8 : i32
    %10 = arith.extui %9 : i1 to i32
    %c0_i32_9 = arith.constant 0 : i32
    %11 = arith.cmpi ne, %10, %c0_i32_9 : i32
    scf.if %11 {
      %c0_10 = arith.constant 0 : index
      %c0_11 = arith.constant 0 : index
      %12 = vector.load %arg7[%c0_10, %c0_11] : memref<16x128xf32, #tpu.memory_space<vmem>>, vector<16x128xf32>
      %c0_12 = arith.constant 0 : index
      %c0_13 = arith.constant 0 : index
      %13 = vector.load %arg5[%c0_12, %c0_13] : memref<1x128xf32, #tpu.memory_space<vmem>>, vector<1x128xf32>
      %14 = vector.broadcast %13 : vector<1x128xf32> to vector<16x128xf32>
      %15 = arith.mulf %12, %14 : vector<16x128xf32>
      %c0_14 = arith.constant 0 : index
      %c0_15 = arith.constant 0 : index
      %16 = vector.load %arg6[%c0_14, %c0_15] : memref<1x128xf32, #tpu.memory_space<vmem>>, vector<1x128xf32>
      %17 = vector.broadcast %16 : vector<1x128xf32> to vector<16x128xf32>
      %18 = arith.addf %15, %17 : vector<16x128xf32>
      %cst_16 = arith.constant 0.000000e+00 : f32
      %19 = vector.broadcast %cst_16 : f32 to vector<16x128xf32>
      %20 = arith.maximumf %18, %19 : vector<16x128xf32>
      %c0_17 = arith.constant 0 : index
      %c0_18 = arith.constant 0 : index
      %21 = vector.load %arg7[%c0_17, %c0_18] : memref<16x128xf32, #tpu.memory_space<vmem>>, vector<16x128xf32>
      tpu.vector_store %arg7[%c0_17, %c0_18], %20 {strides = array<i32>} : memref<16x128xf32, #tpu.memory_space<vmem>>, vector<16x128xf32>,
    } else {
    }
    return
  }
  func.func @transform_0(%arg0: i32, %arg1: i32, %arg2: i32) -> (i32, i32) {
    %c0_i32 = arith.constant 0 : i32
    return %arg0, %arg2 : i32, i32
  }
  func.func @transform_1(%arg0: i32, %arg1: i32, %arg2: i32) -> (i32, i32) {
    %c0_i32 = arith.constant 0 : i32
    return %arg2, %arg1 : i32, i32
  }
  func.func @transform_2(%arg0: i32, %arg1: i32, %arg2: i32) -> (i32, i32) {
    %c0_i32 = arith.constant 0 : i32
    %c0_i32_0 = arith.constant 0 : i32
    return %c0_i32, %arg1 : i32, i32
  }
  func.func @transform_3(%arg0: i32, %arg1: i32, %arg2: i32) -> (i32, i32) {
    %c0_i32 = arith.constant 0 : i32
    %c0_i32_0 = arith.constant 0 : i32
    return %c0_i32, %arg1 : i32, i32
  }
  func.func @transform_4(%arg0: i32, %arg1: i32, %arg2: i32) -> (i32, i32) {
    %c0_i32 = arith.constant 0 : i32
    return %arg0, %arg1 : i32, i32
  }
}

module attributes {stable_mosaic.version = 11 : i64} {
  func.func @_gemm_bn_act_kernel(%arg0: i32, %arg1: i32, %arg2: i32, %arg3: memref<32x128xbf16, #tpu.memory_space<vmem>>, %arg4: memref<128x128xbf16, #tpu.memory_space<vmem>>, %arg5: memref<1x128xf32, #tpu.memory_space<vmem>>, %arg6: memref<1x128xf32, #tpu.memory_space<vmem>>, %arg7: memref<32x128xf32, #tpu.memory_space<vmem>>) attributes {dimension_semantics = [#tpu.dimension_semantics<parallel>, #tpu.dimension_semantics<parallel>, #tpu.dimension_semantics<arbitrary>], iteration_bounds = array<i64: 1, 1, 1>, scalar_prefetch = 0 : i64, scratch_operands = 0 : i64, tpu.core_type = #tpu.core_type<tc>, window_params = [{transform_indices = @transform_0, window_bounds = array<i64: 32, 128>}, {transform_indices = @transform_1, window_bounds = array<i64: 128, 128>}, {transform_indices = @transform_2, window_bounds = array<i64: 1, 128>}, {transform_indices = @transform_3, window_bounds = array<i64: 1, 128>}, {transform_indices = @transform_4, window_bounds = array<i64: 32, 128>}]} {
    %c0_i32 = arith.constant 0 : i32
    %0 = arith.cmpi eq, %arg2, %c0_i32 : i32
    %1 = arith.extui %0 : i1 to i32
    %c0_i32_0 = arith.constant 0 : i32
    %2 = arith.cmpi ne, %1, %c0_i32_0 : i32
    scf.if %2 {
      %cst_10 = arith.constant 0.000000e+00 : f32
      %12 = vector.broadcast %cst_10 : f32 to vector<32x128xf32>
      %c0_11 = arith.constant 0 : index
      %c0_12 = arith.constant 0 : index
      %13 = vector.load %arg7[%c0_11, %c0_12] : memref<32x128xf32, #tpu.memory_space<vmem>>, vector<32x128xf32>
      tpu.vector_store %arg7[%c0_11, %c0_12], %12 {strides = array<i32>} : memref<32x128xf32, #tpu.memory_space<vmem>>, vector<32x128xf32>,
    } else {
    }
    %c0 = arith.constant 0 : index
    %c0_1 = arith.constant 0 : index
    %3 = vector.load %arg7[%c0, %c0_1] : memref<32x128xf32, #tpu.memory_space<vmem>>, vector<32x128xf32>
    %c0_2 = arith.constant 0 : index
    %c0_3 = arith.constant 0 : index
    %4 = vector.load %arg3[%c0_2, %c0_3] : memref<32x128xbf16, #tpu.memory_space<vmem>>, vector<32x128xbf16>
    %c0_4 = arith.constant 0 : index
    %c0_5 = arith.constant 0 : index
    %5 = vector.load %arg4[%c0_4, %c0_5] : memref<128x128xbf16, #tpu.memory_space<vmem>>, vector<128x128xbf16>
    %cst = arith.constant dense<0.000000e+00> : vector<32x128xf32>
    %6 = tpu.matmul %4, %5, %cst {dimension_numbers = #tpu.dot_dimension_numbers<[1], [0], [0], [1], [0, 0, 1, 1], [], []>} : vector<32x128xbf16>, vector<128x128xbf16>, vector<32x128xf32> -> vector<32x128xf32>
    %7 = arith.addf %3, %6 : vector<32x128xf32>
    %c0_6 = arith.constant 0 : index
    %c0_7 = arith.constant 0 : index
    %8 = vector.load %arg7[%c0_6, %c0_7] : memref<32x128xf32, #tpu.memory_space<vmem>>, vector<32x128xf32>
    tpu.vector_store %arg7[%c0_6, %c0_7], %7 {strides = array<i32>} : memref<32x128xf32, #tpu.memory_space<vmem>>, vector<32x128xf32>,
    %c0_i32_8 = arith.constant 0 : i32
    %9 = arith.cmpi eq, %arg2, %c0_i32_8 : i32
    %10 = arith.extui %9 : i1 to i32
    %c0_i32_9 = arith.constant 0 : i32
    %11 = arith.cmpi ne, %10, %c0_i32_9 : i32
    scf.if %11 {
      %c0_10 = arith.constant 0 : index
      %c0_11 = arith.constant 0 : index
      %12 = vector.load %arg7[%c0_10, %c0_11] : memref<32x128xf32, #tpu.memory_space<vmem>>, vector<32x128xf32>
      %c0_12 = arith.constant 0 : index
      %c0_13 = arith.constant 0 : index
      %13 = vector.load %arg5[%c0_12, %c0_13] : memref<1x128xf32, #tpu.memory_space<vmem>>, vector<1x128xf32>
      %14 = vector.broadcast %13 : vector<1x128xf32> to vector<32x128xf32>
      %15 = arith.mulf %12, %14 : vector<32x128xf32>
      %c0_14 = arith.constant 0 : index
      %c0_15 = arith.constant 0 : index
      %16 = vector.load %arg6[%c0_14, %c0_15] : memref<1x128xf32, #tpu.memory_space<vmem>>, vector<1x128xf32>
      %17 = vector.broadcast %16 : vector<1x128xf32> to vector<32x128xf32>
      %18 = arith.addf %15, %17 : vector<32x128xf32>
      %cst_16 = arith.constant 0.000000e+00 : f32
      %19 = vector.broadcast %cst_16 : f32 to vector<32x128xf32>
      %20 = arith.maximumf %18, %19 : vector<32x128xf32>
      %c0_17 = arith.constant 0 : index
      %c0_18 = arith.constant 0 : index
      %21 = vector.load %arg7[%c0_17, %c0_18] : memref<32x128xf32, #tpu.memory_space<vmem>>, vector<32x128xf32>
      tpu.vector_store %arg7[%c0_17, %c0_18], %20 {strides = array<i32>} : memref<32x128xf32, #tpu.memory_space<vmem>>, vector<32x128xf32>,
    } else {
    }
    return
  }
  func.func @transform_0(%arg0: i32, %arg1: i32, %arg2: i32) -> (i32, i32) {
    %c0_i32 = arith.constant 0 : i32
    return %arg0, %arg2 : i32, i32
  }
  func.func @transform_1(%arg0: i32, %arg1: i32, %arg2: i32) -> (i32, i32) {
    %c0_i32 = arith.constant 0 : i32
    return %arg2, %arg1 : i32, i32
  }
  func.func @transform_2(%arg0: i32, %arg1: i32, %arg2: i32) -> (i32, i32) {
    %c0_i32 = arith.constant 0 : i32
    %c0_i32_0 = arith.constant 0 : i32
    return %c0_i32, %arg1 : i32, i32
  }
  func.func @transform_3(%arg0: i32, %arg1: i32, %arg2: i32) -> (i32, i32) {
    %c0_i32 = arith.constant 0 : i32
    %c0_i32_0 = arith.constant 0 : i32
    return %c0_i32, %arg1 : i32, i32
  }
  func.func @transform_4(%arg0: i32, %arg1: i32, %arg2: i32) -> (i32, i32) {
    %c0_i32 = arith.constant 0 : i32
    return %arg0, %arg1 : i32, i32
  }
}

module attributes {stable_mosaic.version = 11 : i64} {
  func.func @_gemm_bn_act_kernel(%arg0: i32, %arg1: i32, %arg2: i32, %arg3: memref<128x128xbf16, #tpu.memory_space<vmem>>, %arg4: memref<128x128xbf16, #tpu.memory_space<vmem>>, %arg5: memref<1x128xf32, #tpu.memory_space<vmem>>, %arg6: memref<1x128xf32, #tpu.memory_space<vmem>>, %arg7: memref<128x128xf32, #tpu.memory_space<vmem>>) attributes {dimension_semantics = [#tpu.dimension_semantics<parallel>, #tpu.dimension_semantics<parallel>, #tpu.dimension_semantics<arbitrary>], iteration_bounds = array<i64: 1, 1, 1>, scalar_prefetch = 0 : i64, scratch_operands = 0 : i64, tpu.core_type = #tpu.core_type<tc>, window_params = [{transform_indices = @transform_0, window_bounds = array<i64: 128, 128>}, {transform_indices = @transform_1, window_bounds = array<i64: 128, 128>}, {transform_indices = @transform_2, window_bounds = array<i64: 1, 128>}, {transform_indices = @transform_3, window_bounds = array<i64: 1, 128>}, {transform_indices = @transform_4, window_bounds = array<i64: 128, 128>}]} {
    %c0_i32 = arith.constant 0 : i32
    %0 = arith.cmpi eq, %arg2, %c0_i32 : i32
    %1 = arith.extui %0 : i1 to i32
    %c0_i32_0 = arith.constant 0 : i32
    %2 = arith.cmpi ne, %1, %c0_i32_0 : i32
    scf.if %2 {
      %cst_10 = arith.constant 0.000000e+00 : f32
      %12 = vector.broadcast %cst_10 : f32 to vector<128x128xf32>
      %c0_11 = arith.constant 0 : index
      %c0_12 = arith.constant 0 : index
      %13 = vector.load %arg7[%c0_11, %c0_12] : memref<128x128xf32, #tpu.memory_space<vmem>>, vector<128x128xf32>
      tpu.vector_store %arg7[%c0_11, %c0_12], %12 {strides = array<i32>} : memref<128x128xf32, #tpu.memory_space<vmem>>, vector<128x128xf32>,
    } else {
    }
    %c0 = arith.constant 0 : index
    %c0_1 = arith.constant 0 : index
    %3 = vector.load %arg7[%c0, %c0_1] : memref<128x128xf32, #tpu.memory_space<vmem>>, vector<128x128xf32>
    %c0_2 = arith.constant 0 : index
    %c0_3 = arith.constant 0 : index
    %4 = vector.load %arg3[%c0_2, %c0_3] : memref<128x128xbf16, #tpu.memory_space<vmem>>, vector<128x128xbf16>
    %c0_4 = arith.constant 0 : index
    %c0_5 = arith.constant 0 : index
    %5 = vector.load %arg4[%c0_4, %c0_5] : memref<128x128xbf16, #tpu.memory_space<vmem>>, vector<128x128xbf16>
    %cst = arith.constant dense<0.000000e+00> : vector<128x128xf32>
    %6 = tpu.matmul %4, %5, %cst {dimension_numbers = #tpu.dot_dimension_numbers<[1], [0], [0], [1], [0, 0, 1, 1], [], []>} : vector<128x128xbf16>, vector<128x128xbf16>, vector<128x128xf32> -> vector<128x128xf32>
    %7 = arith.addf %3, %6 : vector<128x128xf32>
    %c0_6 = arith.constant 0 : index
    %c0_7 = arith.constant 0 : index
    %8 = vector.load %arg7[%c0_6, %c0_7] : memref<128x128xf32, #tpu.memory_space<vmem>>, vector<128x128xf32>
    tpu.vector_store %arg7[%c0_6, %c0_7], %7 {strides = array<i32>} : memref<128x128xf32, #tpu.memory_space<vmem>>, vector<128x128xf32>,
    %c0_i32_8 = arith.constant 0 : i32
    %9 = arith.cmpi eq, %arg2, %c0_i32_8 : i32
    %10 = arith.extui %9 : i1 to i32
    %c0_i32_9 = arith.constant 0 : i32
    %11 = arith.cmpi ne, %10, %c0_i32_9 : i32
    scf.if %11 {
      %c0_10 = arith.constant 0 : index
      %c0_11 = arith.constant 0 : index
      %12 = vector.load %arg7[%c0_10, %c0_11] : memref<128x128xf32, #tpu.memory_space<vmem>>, vector<128x128xf32>
      %c0_12 = arith.constant 0 : index
      %c0_13 = arith.constant 0 : index
      %13 = vector.load %arg5[%c0_12, %c0_13] : memref<1x128xf32, #tpu.memory_space<vmem>>, vector<1x128xf32>
      %14 = vector.broadcast %13 : vector<1x128xf32> to vector<128x128xf32>
      %15 = arith.mulf %12, %14 : vector<128x128xf32>
      %c0_14 = arith.constant 0 : index
      %c0_15 = arith.constant 0 : index
      %16 = vector.load %arg6[%c0_14, %c0_15] : memref<1x128xf32, #tpu.memory_space<vmem>>, vector<1x128xf32>
      %17 = vector.broadcast %16 : vector<1x128xf32> to vector<128x128xf32>
      %18 = arith.addf %15, %17 : vector<128x128xf32>
      %cst_16 = arith.constant 0.000000e+00 : f32
      %19 = vector.broadcast %cst_16 : f32 to vector<128x128xf32>
      %20 = arith.maximumf %18, %19 : vector<128x128xf32>
      %c0_17 = arith.constant 0 : index
      %c0_18 = arith.constant 0 : index
      %21 = vector.load %arg7[%c0_17, %c0_18] : memref<128x128xf32, #tpu.memory_space<vmem>>, vector<128x128xf32>
      tpu.vector_store %arg7[%c0_17, %c0_18], %20 {strides = array<i32>} : memref<128x128xf32, #tpu.memory_space<vmem>>, vector<128x128xf32>,
    } else {
    }
    return
  }
  func.func @transform_0(%arg0: i32, %arg1: i32, %arg2: i32) -> (i32, i32) {
    %c0_i32 = arith.constant 0 : i32
    return %arg0, %arg2 : i32, i32
  }
  func.func @transform_1(%arg0: i32, %arg1: i32, %arg2: i32) -> (i32, i32) {
    %c0_i32 = arith.constant 0 : i32
    return %arg2, %arg1 : i32, i32
  }
  func.func @transform_2(%arg0: i32, %arg1: i32, %arg2: i32) -> (i32, i32) {
    %c0_i32 = arith.constant 0 : i32
    %c0_i32_0 = arith.constant 0 : i32
    return %c0_i32, %arg1 : i32, i32
  }
  func.func @transform_3(%arg0: i32, %arg1: i32, %arg2: i32) -> (i32, i32) {
    %c0_i32 = arith.constant 0 : i32
    %c0_i32_0 = arith.constant 0 : i32
    return %c0_i32, %arg1 : i32, i32
  }
  func.func @transform_4(%arg0: i32, %arg1: i32, %arg2: i32) -> (i32, i32) {
    %c0_i32 = arith.constant 0 : i32
    return %arg0, %arg1 : i32, i32
  }
}

module attributes {stable_mosaic.version = 11 : i64} {
  func.func @_gemm_bn_act_kernel(%arg0: i32, %arg1: i32, %arg2: i32, %arg3: memref<512x128xbf16, #tpu.memory_space<vmem>>, %arg4: memref<128x128xbf16, #tpu.memory_space<vmem>>, %arg5: memref<1x128xf32, #tpu.memory_space<vmem>>, %arg6: memref<1x128xf32, #tpu.memory_space<vmem>>, %arg7: memref<512x128xf32, #tpu.memory_space<vmem>>) attributes {dimension_semantics = [#tpu.dimension_semantics<parallel>, #tpu.dimension_semantics<parallel>, #tpu.dimension_semantics<arbitrary>], iteration_bounds = array<i64: 1, 1, 1>, scalar_prefetch = 0 : i64, scratch_operands = 0 : i64, tpu.core_type = #tpu.core_type<tc>, window_params = [{transform_indices = @transform_0, window_bounds = array<i64: 512, 128>}, {transform_indices = @transform_1, window_bounds = array<i64: 128, 128>}, {transform_indices = @transform_2, window_bounds = array<i64: 1, 128>}, {transform_indices = @transform_3, window_bounds = array<i64: 1, 128>}, {transform_indices = @transform_4, window_bounds = array<i64: 512, 128>}]} {
    %c0_i32 = arith.constant 0 : i32
    %0 = arith.cmpi eq, %arg2, %c0_i32 : i32
    %1 = arith.extui %0 : i1 to i32
    %c0_i32_0 = arith.constant 0 : i32
    %2 = arith.cmpi ne, %1, %c0_i32_0 : i32
    scf.if %2 {
      %cst_10 = arith.constant 0.000000e+00 : f32
      %12 = vector.broadcast %cst_10 : f32 to vector<512x128xf32>
      %c0_11 = arith.constant 0 : index
      %c0_12 = arith.constant 0 : index
      %13 = vector.load %arg7[%c0_11, %c0_12] : memref<512x128xf32, #tpu.memory_space<vmem>>, vector<512x128xf32>
      tpu.vector_store %arg7[%c0_11, %c0_12], %12 {strides = array<i32>} : memref<512x128xf32, #tpu.memory_space<vmem>>, vector<512x128xf32>,
    } else {
    }
    %c0 = arith.constant 0 : index
    %c0_1 = arith.constant 0 : index
    %3 = vector.load %arg7[%c0, %c0_1] : memref<512x128xf32, #tpu.memory_space<vmem>>, vector<512x128xf32>
    %c0_2 = arith.constant 0 : index
    %c0_3 = arith.constant 0 : index
    %4 = vector.load %arg3[%c0_2, %c0_3] : memref<512x128xbf16, #tpu.memory_space<vmem>>, vector<512x128xbf16>
    %c0_4 = arith.constant 0 : index
    %c0_5 = arith.constant 0 : index
    %5 = vector.load %arg4[%c0_4, %c0_5] : memref<128x128xbf16, #tpu.memory_space<vmem>>, vector<128x128xbf16>
    %cst = arith.constant dense<0.000000e+00> : vector<512x128xf32>
    %6 = tpu.matmul %4, %5, %cst {dimension_numbers = #tpu.dot_dimension_numbers<[1], [0], [0], [1], [0, 0, 1, 1], [], []>} : vector<512x128xbf16>, vector<128x128xbf16>, vector<512x128xf32> -> vector<512x128xf32>
    %7 = arith.addf %3, %6 : vector<512x128xf32>
    %c0_6 = arith.constant 0 : index
    %c0_7 = arith.constant 0 : index
    %8 = vector.load %arg7[%c0_6, %c0_7] : memref<512x128xf32, #tpu.memory_space<vmem>>, vector<512x128xf32>
    tpu.vector_store %arg7[%c0_6, %c0_7], %7 {strides = array<i32>} : memref<512x128xf32, #tpu.memory_space<vmem>>, vector<512x128xf32>,
    %c0_i32_8 = arith.constant 0 : i32
    %9 = arith.cmpi eq, %arg2, %c0_i32_8 : i32
    %10 = arith.extui %9 : i1 to i32
    %c0_i32_9 = arith.constant 0 : i32
    %11 = arith.cmpi ne, %10, %c0_i32_9 : i32
    scf.if %11 {
      %c0_10 = arith.constant 0 : index
      %c0_11 = arith.constant 0 : index
      %12 = vector.load %arg7[%c0_10, %c0_11] : memref<512x128xf32, #tpu.memory_space<vmem>>, vector<512x128xf32>
      %c0_12 = arith.constant 0 : index
      %c0_13 = arith.constant 0 : index
      %13 = vector.load %arg5[%c0_12, %c0_13] : memref<1x128xf32, #tpu.memory_space<vmem>>, vector<1x128xf32>
      %14 = vector.broadcast %13 : vector<1x128xf32> to vector<512x128xf32>
      %15 = arith.mulf %12, %14 : vector<512x128xf32>
      %c0_14 = arith.constant 0 : index
      %c0_15 = arith.constant 0 : index
      %16 = vector.load %arg6[%c0_14, %c0_15] : memref<1x128xf32, #tpu.memory_space<vmem>>, vector<1x128xf32>
      %17 = vector.broadcast %16 : vector<1x128xf32> to vector<512x128xf32>
      %18 = arith.addf %15, %17 : vector<512x128xf32>
      %19 = arith.negf %18 : vector<512x128xf32>
      %20 = math.exp %19 : vector<512x128xf32>
      %cst_16 = arith.constant 1.000000e+00 : f32
      %21 = vector.broadcast %cst_16 : f32 to vector<512x128xf32>
      %22 = arith.addf %21, %20 : vector<512x128xf32>
      %23 = arith.divf %21, %22 : vector<512x128xf32>
      %c0_17 = arith.constant 0 : index
      %c0_18 = arith.constant 0 : index
      %24 = vector.load %arg7[%c0_17, %c0_18] : memref<512x128xf32, #tpu.memory_space<vmem>>, vector<512x128xf32>
      tpu.vector_store %arg7[%c0_17, %c0_18], %23 {strides = array<i32>} : memref<512x128xf32, #tpu.memory_space<vmem>>, vector<512x128xf32>,
    } else {
    }
    return
  }
  func.func @transform_0(%arg0: i32, %arg1: i32, %arg2: i32) -> (i32, i32) {
    %c0_i32 = arith.constant 0 : i32
    return %arg0, %arg2 : i32, i32
  }
  func.func @transform_1(%arg0: i32, %arg1: i32, %arg2: i32) -> (i32, i32) {
    %c0_i32 = arith.constant 0 : i32
    return %arg2, %arg1 : i32, i32
  }
  func.func @transform_2(%arg0: i32, %arg1: i32, %arg2: i32) -> (i32, i32) {
    %c0_i32 = arith.constant 0 : i32
    %c0_i32_0 = arith.constant 0 : i32
    return %c0_i32, %arg1 : i32, i32
  }
  func.func @transform_3(%arg0: i32, %arg1: i32, %arg2: i32) -> (i32, i32) {
    %c0_i32 = arith.constant 0 : i32
    %c0_i32_0 = arith.constant 0 : i32
    return %c0_i32, %arg1 : i32, i32
  }
  func.func @transform_4(%arg0: i32, %arg1: i32, %arg2: i32) -> (i32, i32) {
    %c0_i32 = arith.constant 0 : i32
    return %arg0, %arg1 : i32, i32
  }
}

</mosaic_0001>

<bundles_post_ra>
// kernel: generator_forward.14
= control target key start
LH: loop header
LB: loop body
LE: loop exit
PB: predicated region body
PF: predicated region fallthrough
CT: control target
= control target key end

     0   :  { %v225_v0 = vmov 0.0   ;;  %vm226_vm0 = vmmov 0   ;;  %s291_s1 = inlined_call_operand.vmem [shape: bf16[128,128], index: 1, kind: input, shape index: {}]   ;;  %s292_s0 = inlined_call_operand.vmem [shape: bf16[16,128], index: 0, kind: input, shape index: {}]   ;;  %s293_s2 = inlined_call_operand.vmem [shape: f32[1,128], index: 2, kind: input, shape index: {}]   ;;  %s294_s3 = inlined_call_operand.vmem [shape: f32[1,128], index: 3, kind: input, shape index: {}]   ;;  %s295_s4 = inlined_call_operand.vmem [shape: f32[16,128], index: 4, kind: output, shape index: {}]  }
   0x1   :  { %194 = vmatprep.subr.bf16.mxu0 %v225_v0  ;;  %v216_v1 = vld [vmem:[%s291_s1] sm:$0xff]   ;;  %210 = vmatprep.mubr.msk.bf16.mxu0 %vm226_vm0, %v225_v0  ;;  %v217_v2 = vld [vmem:[%s291_s1 + $0x8] sm:$0xff]   ;;  %v218_v3 = vld [vmem:[%s291_s1 + $0x10] sm:$0xff]  }
   0x2   :  { %195 = vmatpush3.bf16.msra.mxu0 %v216_v1  ;;  %v219_v4 = vld [vmem:[%s291_s1 + $0x18] sm:$0xff]   ;;  %v220_v5 = vld [vmem:[%s291_s1 + $0x20] sm:$0xff]   ;;  %v221_v6 = vld [vmem:[%s291_s1 + $0x28] sm:$0xff]  }
   0x3   :  { %196 = vmatprep.subr.bf16.mxu0 %v225_v0  ;;  %v222_v7 = vld [vmem:[%s291_s1 + $0x30] sm:$0xff]   ;;  %v223_v8 = vld [vmem:[%s291_s1 + $0x38] sm:$0xff]   ;;  %v224_v9 = vld [vmem:[%s292_s0] sm:$0xff]  }
   0x4   :  { %v183_v11 = vld [vmem:[%s293_s2] ss:$0 sm:$0xff] }
   0x5   :  { %v184_v13 = vld [vmem:[%s294_s3] ss:$0 sm:$0xff] }
   0x6   :  { %197 = vmatpush3.bf16.msra.mxu0 %v217_v2 }
   0x7   :  { %198 = vmatprep.subr.bf16.mxu0 %v225_v0 }
   0xa   :  { %199 = vmatpush3.bf16.msra.mxu0 %v218_v3 }
   0xb   :  { %200 = vmatprep.subr.bf16.mxu0 %v225_v0 }
   0xe   :  { %201 = vmatpush3.bf16.msra.mxu0 %v219_v4 }
   0xf   :  { %202 = vmatprep.subr.bf16.mxu0 %v225_v0 }
  0x12   :  { %203 = vmatpush3.bf16.msra.mxu0 %v220_v5 }
  0x13   :  { %204 = vmatprep.subr.bf16.mxu0 %v225_v0 }
  0x16   :  { %205 = vmatpush3.bf16.msra.mxu0 %v221_v6 }
  0x17   :  { %206 = vmatprep.subr.bf16.mxu0 %v225_v0 }
  0x1a   :  { %207 = vmatpush3.bf16.msra.mxu0 %v222_v7 }
  0x1b   :  { %208 = vmatprep.subr.bf16.mxu0 %v225_v0 }
  0x1e   :  { %209 = vmatpush3.bf16.msra.mxu0 %v223_v8 }
  0x21   :  { %211 = vmatmul.mubr.bf16.vlgmr.msra.gmra.mrb[0].mxu0 %v224_v9 }
  0xf4   :  { %v132_v10 = vpop.f32.mrb[0].mxu0 }
  0xf5   :  { %v212_v12 = vpop.f32.mrb[1].mxu0  ;;  %v155_v15 = vmul.f32 %v183_v11, %v132_v10 }
  0xf6   :  { %v135_v14 = vpop.f32.mrb[2].mxu0 }
  0xf7   :  { %v213_v16 = vpop.f32.mrb[3].mxu0  ;;  %v164_v17 = vadd.f32 %v184_v13, %v155_v15  ;;  %v156_v18 = vmul.f32 %v183_v11, %v135_v14 }
  0xf9   :  { %v166_v19 = vmax.f32 %v164_v17, 0.0  ;;  %v165_v20 = vadd.f32 %v184_v13, %v156_v18 }
  0xfb   :  { %168 = vst [vmem:[%s295_s4] sm:$0xff] %v166_v19  ;;  %v167_v21 = vmax.f32 %v165_v20, 0.0 }
  0xfd   :  { %169 = vst [vmem:[%s295_s4 + $0x8] sm:$0xff] %v167_v21 }

// kernel: generator_forward.19
= control target key start
LH: loop header
LB: loop body
LE: loop exit
PB: predicated region body
PF: predicated region fallthrough
CT: control target
= control target key end

     0   :  { %s334_s1 = inlined_call_operand.vmem [shape: bf16[128,128], index: 1, kind: input, shape index: {}]   ;;  %s335_s0 = inlined_call_operand.vmem [shape: bf16[32,128], index: 0, kind: input, shape index: {}]   ;;  %s336_s2 = inlined_call_operand.vmem [shape: f32[1,128], index: 2, kind: input, shape index: {}]   ;;  %s337_s3 = inlined_call_operand.vmem [shape: f32[1,128], index: 3, kind: input, shape index: {}]   ;;  %s338_s4 = inlined_call_operand.vmem [shape: f32[32,128], index: 4, kind: output, shape index: {}]  }
   0x1   :  { %v251_v0 = vld [vmem:[%s334_s1] sm:$0xff]   ;;  %v252_v1 = vld [vmem:[%s334_s1 + $0x8] sm:$0xff]   ;;  %v253_v2 = vld [vmem:[%s334_s1 + $0x10] sm:$0xff]  }
   0x2   :  { %230 = vmatprep.subr.bf16.mxu0 %v251_v0  ;;  %v254_v3 = vld [vmem:[%s334_s1 + $0x18] sm:$0xff]   ;;  %v259_v4 = vld [vmem:[%s335_s0] sm:$0xff]   ;;  %v256_v6 = vld [vmem:[%s334_s1 + $0x28] sm:$0xff]  }
   0x3   :  { %231 = vmatpush3.bf16.msra.mxu0 %v251_v0  ;;  %246 = vmatprep.mubr.bf16.mxu0 %v259_v4  ;;  %v255_v5 = vld [vmem:[%s334_s1 + $0x20] sm:$0xff]   ;;  %v257_v7 = vld [vmem:[%s334_s1 + $0x30] sm:$0xff]   ;;  %v258_v8 = vld [vmem:[%s334_s1 + $0x38] sm:$0xff]  }
   0x4   :  { %232 = vmatprep.subr.bf16.mxu0 %v252_v1  ;;  %v260_v9 = vld [vmem:[%s335_s0 + $0x8] sm:$0xff]   ;;  %v218_v11 = vld [vmem:[%s336_s2] ss:$0 sm:$0xff] }
   0x5   :  { %v219_v13 = vld [vmem:[%s337_s3] ss:$0 sm:$0xff] }
   0x7   :  { %233 = vmatpush3.bf16.msra.mxu0 %v252_v1 }
   0x8   :  { %234 = vmatprep.subr.bf16.mxu0 %v253_v2 }
   0xb   :  { %235 = vmatpush3.bf16.msra.mxu0 %v253_v2 }
   0xc   :  { %236 = vmatprep.subr.bf16.mxu0 %v254_v3 }
   0xf   :  { %237 = vmatpush3.bf16.msra.mxu0 %v254_v3 }
  0x10   :  { %238 = vmatprep.subr.bf16.mxu0 %v255_v5 }
  0x13   :  { %239 = vmatpush3.bf16.msra.mxu0 %v255_v5 }
  0x14   :  { %240 = vmatprep.subr.bf16.mxu0 %v256_v6 }
  0x17   :  { %241 = vmatpush3.bf16.msra.mxu0 %v256_v6 }
  0x18   :  { %242 = vmatprep.subr.bf16.mxu0 %v257_v7 }
  0x1b   :  { %243 = vmatpush3.bf16.msra.mxu0 %v257_v7 }
  0x1c   :  { %244 = vmatprep.subr.bf16.mxu0 %v258_v8 }
  0x1f   :  { %245 = vmatpush3.bf16.msra.mxu0 %v258_v8 }
  0x22   :  { %247 = vmatmul.mubr.bf16.vlgmr.msra.gmra.mrb[0].mxu0 %v260_v9 }
  0xf5   :  { %v248_v10 = vpop.f32.mrb[0].mxu0 }
  0xf6   :  { %v144_v12 = vpop.f32.mrb[1].mxu0  ;;  %v183_v15 = vmul.f32 %v248_v10, %v218_v11 }
  0xf7   :  { %v249_v14 = vpop.f32.mrb[2].mxu0  ;;  %v181_v17 = vmul.f32 %v218_v11, %v144_v12 }
  0xf8   :  { %v147_v16 = vpop.f32.mrb[3].mxu0  ;;  %v194_v18 = vadd.f32 %v219_v13, %v183_v15  ;;  %v184_v19 = vmul.f32 %v249_v14, %v218_v11 }
  0xf9   :  { %v192_v20 = vadd.f32 %v219_v13, %v181_v17  ;;  %v182_v21 = vmul.f32 %v218_v11, %v147_v16 }
  0xfa   :  { %v198_v22 = vmax.f32 %v194_v18, 0.0  ;;  %v195_v23 = vadd.f32 %v219_v13, %v184_v19 }
  0xfb   :  { %v196_v24 = vmax.f32 %v192_v20, 0.0  ;;  %v193_v25 = vadd.f32 %v219_v13, %v182_v21 }
  0xfc   :  { %202 = vst [vmem:[%s338_s4 + $0x10] sm:$0xff] %v198_v22  ;;  %v199_v26 = vmax.f32 %v195_v23, 0.0 }
  0xfd   :  { %200 = vst [vmem:[%s338_s4] sm:$0xff] %v196_v24  ;;  %v197_v27 = vmax.f32 %v193_v25, 0.0 }
  0xfe   :  { %203 = vst [vmem:[%s338_s4 + $0x18] sm:$0xff] %v199_v26 }
  0xff   :  { %201 = vst [vmem:[%s338_s4 + $0x8] sm:$0xff] %v197_v27 }

// kernel: generator_forward.23
= control target key start
LH: loop header
LB: loop body
LE: loop exit
PB: predicated region body
PF: predicated region fallthrough
CT: control target
= control target key end

     0   :  { %s656_s1 = inlined_call_operand.vmem [shape: bf16[128,128], index: 1, kind: input, shape index: {}]   ;;  %s657_s0 = inlined_call_operand.vmem [shape: bf16[128,128], index: 0, kind: input, shape index: {}]   ;;  %s658_s2 = inlined_call_operand.vmem [shape: f32[1,128], index: 2, kind: input, shape index: {}]   ;;  %s659_s3 = inlined_call_operand.vmem [shape: f32[1,128], index: 3, kind: input, shape index: {}]   ;;  %s660_s4 = inlined_call_operand.vmem [shape: f32[128,128], index: 4, kind: output, shape index: {}]  }
   0x1   :  { %v495_v0 = vld [vmem:[%s656_s1] sm:$0xff]   ;;  %v496_v1 = vld [vmem:[%s656_s1 + $0x8] sm:$0xff]   ;;  %v497_v2 = vld [vmem:[%s656_s1 + $0x10] sm:$0xff]  }
   0x2   :  { %446 = vmatprep.subr.bf16.mxu0 %v495_v0  ;;  %478 = vmatprep.subr.bf16.mxu1 %v495_v0  ;;  %v498_v3 = vld [vmem:[%s656_s1 + $0x18] sm:$0xff]   ;;  %v503_v4 = vld [vmem:[%s657_s0] sm:$0xff]   ;;  %v500_v7 = vld [vmem:[%s656_s1 + $0x28] sm:$0xff]  }
   0x3   :  { %447 = vmatpush3.bf16.msra.mxu0 %v495_v0  ;;  %486 = vmatpush3.bf16.msra.mxu1 %v495_v0  ;;  %v504_v5 = vld [vmem:[%s657_s0 + $0x20] sm:$0xff]   ;;  %v501_v8 = vld [vmem:[%s656_s1 + $0x30] sm:$0xff]   ;;  %v502_v9 = vld [vmem:[%s656_s1 + $0x38] sm:$0xff]  }
   0x4   :  { %448 = vmatprep.subr.bf16.mxu0 %v496_v1  ;;  %479 = vmatprep.subr.bf16.mxu1 %v496_v1  ;;  %v499_v6 = vld [vmem:[%s656_s1 + $0x20] sm:$0xff]   ;;  %v505_v10 = vld [vmem:[%s657_s0 + $0x8] sm:$0xff]   ;;  %v507_v12 = vld [vmem:[%s657_s0 + $0x10] sm:$0xff]  }
   0x5   :  { %462 = vmatprep.mubr.bf16.mxu0 %v503_v4  ;;  %470 = vmatprep.mubr.bf16.mxu1 %v504_v5  ;;  %v506_v11 = vld [vmem:[%s657_s0 + $0x28] sm:$0xff]   ;;  %v508_v13 = vld [vmem:[%s657_s0 + $0x30] sm:$0xff]   ;;  %v509_v14 = vld [vmem:[%s657_s0 + $0x18] sm:$0xff]  }
   0x6   :  { %v510_v15 = vld [vmem:[%s657_s0 + $0x38] sm:$0xff]   ;;  %v428_v17 = vld [vmem:[%s658_s2] ss:$0 sm:$0xff] }
   0x7   :  { %449 = vmatpush3.bf16.msra.mxu0 %v496_v1  ;;  %487 = vmatpush3.bf16.msra.mxu1 %v496_v1  ;;  %v590_v21 = vld [vmem:[%s659_s3] ss:$0 sm:$0xff] }
   0x8   :  { %450 = vmatprep.subr.bf16.mxu0 %v497_v2  ;;  %480 = vmatprep.subr.bf16.mxu1 %v497_v2 }
   0xb   :  { %451 = vmatpush3.bf16.msra.mxu0 %v497_v2  ;;  %488 = vmatpush3.bf16.msra.mxu1 %v497_v2 }
   0xc   :  { %452 = vmatprep.subr.bf16.mxu0 %v498_v3  ;;  %481 = vmatprep.subr.bf16.mxu1 %v498_v3 }
   0xf   :  { %453 = vmatpush3.bf16.msra.mxu0 %v498_v3  ;;  %489 = vmatpush3.bf16.msra.mxu1 %v498_v3 }
  0x10   :  { %454 = vmatprep.subr.bf16.mxu0 %v499_v6  ;;  %482 = vmatprep.subr.bf16.mxu1 %v499_v6 }
  0x13   :  { %455 = vmatpush3.bf16.msra.mxu0 %v499_v6  ;;  %490 = vmatpush3.bf16.msra.mxu1 %v499_v6 }
  0x14   :  { %456 = vmatprep.subr.bf16.mxu0 %v500_v7  ;;  %483 = vmatprep.subr.bf16.mxu1 %v500_v7 }
  0x17   :  { %457 = vmatpush3.bf16.msra.mxu0 %v500_v7  ;;  %491 = vmatpush3.bf16.msra.mxu1 %v500_v7 }
  0x18   :  { %458 = vmatprep.subr.bf16.mxu0 %v501_v8  ;;  %484 = vmatprep.subr.bf16.mxu1 %v501_v8 }
  0x1b   :  { %459 = vmatpush3.bf16.msra.mxu0 %v501_v8  ;;  %492 = vmatpush3.bf16.msra.mxu1 %v501_v8 }
  0x1c   :  { %460 = vmatprep.subr.bf16.mxu0 %v502_v9  ;;  %485 = vmatprep.subr.bf16.mxu1 %v502_v9 }
  0x1f   :  { %461 = vmatpush3.bf16.msra.mxu0 %v502_v9  ;;  %493 = vmatpush3.bf16.msra.mxu1 %v502_v9 }
  0x22   :  { %463 = vmatmul.mubr.bf16.vlgmr.msra.gmra.mrb[0].mxu0 %v505_v10  ;;  %471 = vmatmul.mubr.bf16.vlgmr.msra.gmra.mrb[0].mxu1 %v506_v11 }
  0x23   :  { %466 = vmatprep.mubr.bf16.mxu0 %v507_v12  ;;  %474 = vmatprep.mubr.bf16.mxu1 %v508_v13 }
  0x2a   :  { %467 = vmatmul.mubr.bf16.gmra.mrb[4].mxu0 %v509_v14  ;;  %475 = vmatmul.mubr.bf16.gmra.mrb[4].mxu1 %v510_v15 }
  0xf5   :  { %v464_v16 = vpop.f32.mrb[0].mxu0  ;;  %v472_v18 = vpop.f32.mrb[0].mxu1 }
  0xf6   :  { %v216_v19 = vpop.f32.mrb[1].mxu0  ;;  %v248_v20 = vpop.f32.mrb[1].mxu1  ;;  %v339_v24 = vmul.f32 %v464_v16, %v428_v17  ;;  %v347_v25 = vmul.f32 %v472_v18, %v428_v17 }
  0xf7   :  { %v465_v22 = vpop.f32.mrb[2].mxu0  ;;  %v473_v23 = vpop.f32.mrb[2].mxu1  ;;  %v337_v28 = vmul.f32 %v428_v17, %v216_v19  ;;  %v345_v29 = vmul.f32 %v428_v17, %v248_v20 }
  0xf8   :  { %v219_v26 = vpop.f32.mrb[3].mxu0  ;;  %v251_v27 = vpop.f32.mrb[3].mxu1  ;;  %v362_v30 = vadd.f32 %v590_v21, %v339_v24  ;;  %v370_v31 = vadd.f32 %v590_v21, %v347_v25  ;;  %v340_v32 = vmul.f32 %v465_v22, %v428_v17  ;;  %v348_v33 = vmul.f32 %v473_v23, %v428_v17 }
  0xf9   :  { %v360_v34 = vadd.f32 %v590_v21, %v337_v28  ;;  %v368_v35 = vadd.f32 %v590_v21, %v345_v29  ;;  %v338_v36 = vmul.f32 %v428_v17, %v219_v26  ;;  %v346_v37 = vmul.f32 %v428_v17, %v251_v27 }
  0xfa   :  { %v378_v38 = vmax.f32 %v362_v30, 0.0  ;;  %v386_v39 = vmax.f32 %v370_v31, 0.0  ;;  %v363_v40 = vadd.f32 %v590_v21, %v340_v32  ;;  %v371_v41 = vadd.f32 %v590_v21, %v348_v33 }
  0xfb   :  { %v376_v42 = vmax.f32 %v360_v34, 0.0  ;;  %v384_v43 = vmax.f32 %v368_v35, 0.0  ;;  %v361_v44 = vadd.f32 %v590_v21, %v338_v36  ;;  %v369_v45 = vadd.f32 %v590_v21, %v346_v37 }
  0xfc   :  { %394 = vst [vmem:[%s660_s4 + $0x10] sm:$0xff] %v378_v38  ;;  %402 = vst [vmem:[%s660_s4 + $0x50] sm:$0xff] %v386_v39  ;;  %v379_v48 = vmax.f32 %v363_v40, 0.0  ;;  %v387_v49 = vmax.f32 %v371_v41, 0.0 }
  0xfd   :  { %v468_v46 = vpop.f32.mrb[4].mxu0  ;;  %v476_v47 = vpop.f32.mrb[4].mxu1  ;;  %392 = vst [vmem:[%s660_s4] sm:$0xff] %v376_v42  ;;  %400 = vst [vmem:[%s660_s4 + $0x40] sm:$0xff] %v384_v43  ;;  %v377_v52 = vmax.f32 %v361_v44, 0.0  ;;  %v385_v53 = vmax.f32 %v369_v45, 0.0 }
  0xfe   :  { %v232_v50 = vpop.f32.mrb[5].mxu0  ;;  %v264_v51 = vpop.f32.mrb[5].mxu1  ;;  %395 = vst [vmem:[%s660_s4 + $0x18] sm:$0xff] %v379_v48  ;;  %403 = vst [vmem:[%s660_s4 + $0x58] sm:$0xff] %v387_v49  ;;  %v343_v56 = vmul.f32 %v468_v46, %v428_v17  ;;  %v351_v57 = vmul.f32 %v476_v47, %v428_v17 }
  0xff   :  { %v469_v54 = vpop.f32.mrb[6].mxu0  ;;  %v477_v55 = vpop.f32.mrb[6].mxu1  ;;  %393 = vst [vmem:[%s660_s4 + $0x8] sm:$0xff] %v377_v52  ;;  %401 = vst [vmem:[%s660_s4 + $0x48] sm:$0xff] %v385_v53  ;;  %v341_v60 = vmul.f32 %v428_v17, %v232_v50  ;;  %v349_v61 = vmul.f32 %v428_v17, %v264_v51 }
 0x100   :  { %v235_v58 = vpop.f32.mrb[7].mxu0  ;;  %v267_v59 = vpop.f32.mrb[7].mxu1  ;;  %v366_v62 = vadd.f32 %v590_v21, %v343_v56  ;;  %v374_v63 = vadd.f32 %v590_v21, %v351_v57  ;;  %v344_v0 = vmul.f32 %v469_v54, %v428_v17  ;;  %v352_v1 = vmul.f32 %v477_v55, %v428_v17 }
 0x101   :  { %v364_v2 = vadd.f32 %v590_v21, %v341_v60  ;;  %v372_v3 = vadd.f32 %v590_v21, %v349_v61  ;;  %v342_v4 = vmul.f32 %v428_v17, %v235_v58  ;;  %v350_v5 = vmul.f32 %v428_v17, %v267_v59 }
 0x102   :  { %v382_v6 = vmax.f32 %v366_v62, 0.0  ;;  %v390_v7 = vmax.f32 %v374_v63, 0.0  ;;  %v367_v8 = vadd.f32 %v590_v21, %v344_v0  ;;  %v375_v9 = vadd.f32 %v590_v21, %v352_v1 }
 0x103   :  { %v380_v10 = vmax.f32 %v364_v2, 0.0  ;;  %v388_v11 = vmax.f32 %v372_v3, 0.0  ;;  %v365_v12 = vadd.f32 %v590_v21, %v342_v4  ;;  %v373_v13 = vadd.f32 %v590_v21, %v350_v5 }
 0x104   :  { %398 = vst [vmem:[%s660_s4 + $0x30] sm:$0xff] %v382_v6  ;;  %406 = vst [vmem:[%s660_s4 + $0x70] sm:$0xff] %v390_v7  ;;  %v383_v14 = vmax.f32 %v367_v8, 0.0  ;;  %v391_v15 = vmax.f32 %v375_v9, 0.0 }
 0x105   :  { %396 = vst [vmem:[%s660_s4 + $0x20] sm:$0xff] %v380_v10  ;;  %404 = vst [vmem:[%s660_s4 + $0x60] sm:$0xff] %v388_v11  ;;  %v381_v16 = vmax.f32 %v365_v12, 0.0  ;;  %v389_v17 = vmax.f32 %v373_v13, 0.0 }
 0x106   :  { %399 = vst [vmem:[%s660_s4 + $0x38] sm:$0xff] %v383_v14  ;;  %407 = vst [vmem:[%s660_s4 + $0x78] sm:$0xff] %v391_v15 }
 0x107   :  { %397 = vst [vmem:[%s660_s4 + $0x28] sm:$0xff] %v381_v16  ;;  %405 = vst [vmem:[%s660_s4 + $0x68] sm:$0xff] %v389_v17 }

// kernel: generator_forward.27
= control target key start
LH: loop header
LB: loop body
LE: loop exit
PB: predicated region body
PF: predicated region fallthrough
CT: control target
= control target key end

     0   :  { %s2715_s1 = inlined_call_operand.vmem [shape: bf16[128,128], index: 1, kind: input, shape index: {}]   ;;  %s2716_s0 = inlined_call_operand.vmem [shape: bf16[512,128], index: 0, kind: input, shape index: {}]   ;;  %s2717_s2 = inlined_call_operand.vmem [shape: f32[1,128], index: 2, kind: input, shape index: {}]   ;;  %s2718_s3 = inlined_call_operand.vmem [shape: f32[1,128], index: 3, kind: input, shape index: {}]   ;;  %s2719_s4 = inlined_call_operand.vmem [shape: f32[512,128], index: 4, kind: output, shape index: {}]  }
   0x1   :  { %v1791_v0 = vld [vmem:[%s2715_s1] sm:$0xff]   ;;  %v1792_v1 = vld [vmem:[%s2715_s1 + $0x8] sm:$0xff]   ;;  %v1793_v2 = vld [vmem:[%s2715_s1 + $0x10] sm:$0xff]  }
   0x2   :  { %1694 = vmatprep.subr.bf16.mxu0 %v1791_v0  ;;  %1774 = vmatprep.subr.bf16.mxu1 %v1791_v0  ;;  %v1794_v3 = vld [vmem:[%s2715_s1 + $0x18] sm:$0xff]   ;;  %v1799_v4 = vld [vmem:[%s2716_s0] sm:$0xff]   ;;  %v1796_v7 = vld [vmem:[%s2715_s1 + $0x28] sm:$0xff]  }
   0x3   :  { %1695 = vmatpush3.bf16.msra.mxu0 %v1791_v0  ;;  %1782 = vmatpush3.bf16.msra.mxu1 %v1791_v0  ;;  %v1800_v5 = vld [vmem:[%s2716_s0 + $0x80] sm:$0xff]   ;;  %v1797_v8 = vld [vmem:[%s2715_s1 + $0x30] sm:$0xff]   ;;  %v1798_v9 = vld [vmem:[%s2715_s1 + $0x38] sm:$0xff]  }
   0x4   :  { %1696 = vmatprep.subr.bf16.mxu0 %v1792_v1  ;;  %1775 = vmatprep.subr.bf16.mxu1 %v1792_v1  ;;  %v1795_v6 = vld [vmem:[%s2715_s1 + $0x20] sm:$0xff]   ;;  %v1801_v10 = vld [vmem:[%s2716_s0 + $0x8] sm:$0xff]   ;;  %v1803_v12 = vld [vmem:[%s2716_s0 + $0x10] sm:$0xff]  }
   0x5   :  { %1710 = vmatprep.mubr.bf16.mxu0 %v1799_v4  ;;  %1742 = vmatprep.mubr.bf16.mxu1 %v1800_v5  ;;  %v1802_v11 = vld [vmem:[%s2716_s0 + $0x88] sm:$0xff]   ;;  %v1804_v13 = vld [vmem:[%s2716_s0 + $0x90] sm:$0xff]   ;;  %v1805_v14 = vld [vmem:[%s2716_s0 + $0x18] sm:$0xff]  }
   0x6   :  { %v1806_v15 = vld [vmem:[%s2716_s0 + $0x98] sm:$0xff]   ;;  %v1807_v16 = vld [vmem:[%s2716_s0 + $0x20] sm:$0xff]   ;;  %v1809_v18 = vld [vmem:[%s2716_s0 + $0x28] sm:$0xff]  }
   0x7   :  { %1697 = vmatpush3.bf16.msra.mxu0 %v1792_v1  ;;  %1783 = vmatpush3.bf16.msra.mxu1 %v1792_v1  ;;  %v1808_v17 = vld [vmem:[%s2716_s0 + $0xa0] sm:$0xff]   ;;  %v1810_v19 = vld [vmem:[%s2716_s0 + $0xa8] sm:$0xff]   ;;  %v1811_v20 = vld [vmem:[%s2716_s0 + $0x30] sm:$0xff]  }
   0x8   :  { %1698 = vmatprep.subr.bf16.mxu0 %v1793_v2  ;;  %1776 = vmatprep.subr.bf16.mxu1 %v1793_v2  ;;  %v1812_v21 = vld [vmem:[%s2716_s0 + $0xb0] sm:$0xff]   ;;  %v1813_v22 = vld [vmem:[%s2716_s0 + $0x38] sm:$0xff]   ;;  %v1815_v24 = vld [vmem:[%s2716_s0 + $0x40] sm:$0xff]  }
   0x9   :  { %v1814_v23 = vld [vmem:[%s2716_s0 + $0xb8] sm:$0xff]   ;;  %v1816_v25 = vld [vmem:[%s2716_s0 + $0xc0] sm:$0xff]   ;;  %v1817_v26 = vld [vmem:[%s2716_s0 + $0x48] sm:$0xff]  }
   0xa   :  { %v1818_v27 = vld [vmem:[%s2716_s0 + $0xc8] sm:$0xff]   ;;  %v1819_v28 = vld [vmem:[%s2716_s0 + $0x50] sm:$0xff]   ;;  %v1821_v30 = vld [vmem:[%s2716_s0 + $0x58] sm:$0xff]  }
   0xb   :  { %1699 = vmatpush3.bf16.msra.mxu0 %v1793_v2  ;;  %1784 = vmatpush3.bf16.msra.mxu1 %v1793_v2  ;;  %v1820_v29 = vld [vmem:[%s2716_s0 + $0xd0] sm:$0xff]   ;;  %v1822_v31 = vld [vmem:[%s2716_s0 + $0xd8] sm:$0xff]   ;;  %v1823_v32 = vld [vmem:[%s2716_s0 + $0x60] sm:$0xff]  }
   0xc   :  { %1700 = vmatprep.subr.bf16.mxu0 %v1794_v3  ;;  %1777 = vmatprep.subr.bf16.mxu1 %v1794_v3  ;;  %v1824_v33 = vld [vmem:[%s2716_s0 + $0xe0] sm:$0xff]   ;;  %v1825_v34 = vld [vmem:[%s2716_s0 + $0x68] sm:$0xff]   ;;  %v1827_v36 = vld [vmem:[%s2716_s0 + $0x70] sm:$0xff]  }
   0xd   :  { %v1826_v35 = vld [vmem:[%s2716_s0 + $0xe8] sm:$0xff]   ;;  %v1828_v37 = vld [vmem:[%s2716_s0 + $0xf0] sm:$0xff]   ;;  %v1829_v38 = vld [vmem:[%s2716_s0 + $0x78] sm:$0xff]  }
   0xe   :  { %v1830_v39 = vld [vmem:[%s2716_s0 + $0xf8] sm:$0xff]   ;;  %v2237_v41 = vld [vmem:[%s2717_s2] ss:$0 sm:$0xff] }
   0xf   :  { %1701 = vmatpush3.bf16.msra.mxu0 %v1794_v3  ;;  %1785 = vmatpush3.bf16.msra.mxu1 %v1794_v3  ;;  %v2242_v45 = vld [vmem:[%s2718_s3] ss:$0 sm:$0xff] }
  0x10   :  { %1702 = vmatprep.subr.bf16.mxu0 %v1795_v6  ;;  %1778 = vmatprep.subr.bf16.mxu1 %v1795_v6 }
  0x13   :  { %1703 = vmatpush3.bf16.msra.mxu0 %v1795_v6  ;;  %1786 = vmatpush3.bf16.msra.mxu1 %v1795_v6 }
  0x14   :  { %1704 = vmatprep.subr.bf16.mxu0 %v1796_v7  ;;  %1779 = vmatprep.subr.bf16.mxu1 %v1796_v7 }
  0x17   :  { %1705 = vmatpush3.bf16.msra.mxu0 %v1796_v7  ;;  %1787 = vmatpush3.bf16.msra.mxu1 %v1796_v7 }
  0x18   :  { %1706 = vmatprep.subr.bf16.mxu0 %v1797_v8  ;;  %1780 = vmatprep.subr.bf16.mxu1 %v1797_v8 }
  0x1b   :  { %1707 = vmatpush3.bf16.msra.mxu0 %v1797_v8  ;;  %1788 = vmatpush3.bf16.msra.mxu1 %v1797_v8 }
  0x1c   :  { %1708 = vmatprep.subr.bf16.mxu0 %v1798_v9  ;;  %1781 = vmatprep.subr.bf16.mxu1 %v1798_v9 }
  0x1f   :  { %1709 = vmatpush3.bf16.msra.mxu0 %v1798_v9  ;;  %1789 = vmatpush3.bf16.msra.mxu1 %v1798_v9 }
  0x22   :  { %1711 = vmatmul.mubr.bf16.vlgmr.msra.gmra.mrb[0].mxu0 %v1801_v10  ;;  %1743 = vmatmul.mubr.bf16.vlgmr.msra.gmra.mrb[0].mxu1 %v1802_v11 }
  0x23   :  { %1714 = vmatprep.mubr.bf16.mxu0 %v1803_v12  ;;  %1746 = vmatprep.mubr.bf16.mxu1 %v1804_v13 }
  0x2a   :  { %1715 = vmatmul.mubr.bf16.gmra.mrb[4].mxu0 %v1805_v14  ;;  %1747 = vmatmul.mubr.bf16.gmra.mrb[4].mxu1 %v1806_v15 }
  0x2b   :  { %1718 = vmatprep.mubr.bf16.mxu0 %v1807_v16  ;;  %1750 = vmatprep.mubr.bf16.mxu1 %v1808_v17 }
  0x32   :  { %1719 = vmatmul.mubr.bf16.gmra.mrb[8].mxu0 %v1809_v18  ;;  %1751 = vmatmul.mubr.bf16.gmra.mrb[8].mxu1 %v1810_v19 }
  0x33   :  { %1722 = vmatprep.mubr.bf16.mxu0 %v1811_v20  ;;  %1754 = vmatprep.mubr.bf16.mxu1 %v1812_v21 }
  0x3a   :  { %1723 = vmatmul.mubr.bf16.gmra.mrb[12].mxu0 %v1813_v22  ;;  %1755 = vmatmul.mubr.bf16.gmra.mrb[12].mxu1 %v1814_v23 }
  0x3b   :  { %1726 = vmatprep.mubr.bf16.mxu0 %v1815_v24  ;;  %1758 = vmatprep.mubr.bf16.mxu1 %v1816_v25 }
  0x42   :  { %1727 = vmatmul.mubr.bf16.gmra.mrb[16].mxu0 %v1817_v26  ;;  %1759 = vmatmul.mubr.bf16.gmra.mrb[16].mxu1 %v1818_v27 }
  0x43   :  { %1730 = vmatprep.mubr.bf16.mxu0 %v1819_v28  ;;  %1762 = vmatprep.mubr.bf16.mxu1 %v1820_v29 }
  0x4a   :  { %1731 = vmatmul.mubr.bf16.gmra.mrb[20].mxu0 %v1821_v30  ;;  %1763 = vmatmul.mubr.bf16.gmra.mrb[20].mxu1 %v1822_v31 }
  0x4b   :  { %1734 = vmatprep.mubr.bf16.mxu0 %v1823_v32  ;;  %1766 = vmatprep.mubr.bf16.mxu1 %v1824_v33 }
  0x52   :  { %1735 = vmatmul.mubr.bf16.gmra.mrb[24].mxu0 %v1825_v34  ;;  %1767 = vmatmul.mubr.bf16.gmra.mrb[24].mxu1 %v1826_v35 }
  0x53   :  { %1738 = vmatprep.mubr.bf16.mxu0 %v1827_v36  ;;  %1770 = vmatprep.mubr.bf16.mxu1 %v1828_v37 }
  0x5a   :  { %1739 = vmatmul.mubr.bf16.gmra.mrb[28].mxu0 %v1829_v38  ;;  %1771 = vmatmul.mubr.bf16.gmra.mrb[28].mxu1 %v1830_v39 }
  0xf5   :  { %v1712_v40 = vpop.f32.mrb[0].mxu0  ;;  %v1744_v42 = vpop.f32.mrb[0].mxu1 }
  0xf6   :  { %v504_v43 = vpop.f32.mrb[1].mxu0  ;;  %v632_v44 = vpop.f32.mrb[1].mxu1  ;;  %v963_v48 = vmul.f32 %v1712_v40, %v2237_v41  ;;  %v995_v49 = vmul.f32 %v1744_v42, %v2237_v41 }
  0xf7   :  { %v1713_v46 = vpop.f32.mrb[2].mxu0  ;;  %v1745_v47 = vpop.f32.mrb[2].mxu1  ;;  %v961_v52 = vmul.f32 %v2237_v41, %v504_v43  ;;  %v993_v53 = vmul.f32 %v2237_v41, %v632_v44 }
  0xf8   :  { %v507_v50 = vpop.f32.mrb[3].mxu0  ;;  %v635_v51 = vpop.f32.mrb[3].mxu1  ;;  %v1034_v54 = vadd.f32 %v2242_v45, %v963_v48  ;;  %v1066_v55 = vadd.f32 %v2242_v45, %v995_v49  ;;  %v964_v56 = vmul.f32 %v1713_v46, %v2237_v41  ;;  %v996_v57 = vmul.f32 %v1745_v47, %v2237_v41 }
  0xf9   :  { %v1032_v58 = vadd.f32 %v2242_v45, %v961_v52  ;;  %v1064_v59 = vadd.f32 %v2242_v45, %v993_v53  ;;  %v962_v60 = vmul.f32 %v2237_v41, %v507_v50  ;;  %v994_v61 = vmul.f32 %v2237_v41, %v635_v51 }
  0xfa   :  { %v1592_v62 = vmul.f32 -1.442695, %v1034_v54  ;;  %v1624_v63 = vmul.f32 -1.442695, %v1066_v55  ;;  %v1035_v0 = vadd.f32 %v2242_v45, %v964_v56  ;;  %v1067_v1 = vadd.f32 %v2242_v45, %v996_v57 }
  0xfb   :  { %v1590_v2 = vmul.f32 -1.442695, %v1032_v58  ;;  %v1622_v3 = vmul.f32 -1.442695, %v1064_v59  ;;  %v1033_v4 = vadd.f32 %v2242_v45, %v962_v60  ;;  %v1065_v5 = vadd.f32 %v2242_v45, %v994_v61 }
  0xfc   :  { %1831 = vpow2.f32 %v1592_v62  ;;  %v1593_v8 = vmul.f32 -1.442695, %v1035_v0  ;;  %v1625_v9 = vmul.f32 -1.442695, %v1067_v1 }
  0xfd   :  { %v1716_v6 = vpop.f32.mrb[4].mxu0  ;;  %v1748_v7 = vpop.f32.mrb[4].mxu1  ;;  %1833 = vpow2.f32 %v1624_v63  ;;  %v1591_v12 = vmul.f32 -1.442695, %v1033_v4  ;;  %v1623_v13 = vmul.f32 -1.442695, %v1065_v5 }
  0xfe   :  { %v520_v10 = vpop.f32.mrb[5].mxu0  ;;  %v648_v11 = vpop.f32.mrb[5].mxu1  ;;  %1835 = vpow2.f32 %v1590_v2  ;;  %v967_v16 = vmul.f32 %v1716_v6, %v2237_v41  ;;  %v999_v19 = vmul.f32 %v1748_v7, %v2237_v41 }
  0xff   :  { %v1717_v14 = vpop.f32.mrb[6].mxu0  ;;  %v1749_v15 = vpop.f32.mrb[6].mxu1  ;;  %1837 = vpow2.f32 %v1622_v3  ;;  %v965_v21 = vmul.f32 %v2237_v41, %v520_v10  ;;  %v997_v22 = vmul.f32 %v2237_v41, %v648_v11 }
 0x100   :  { %v523_v17 = vpop.f32.mrb[7].mxu0  ;;  %v651_v18 = vpop.f32.mrb[7].mxu1  ;;  %1839 = vpow2.f32 %v1593_v8  ;;  %v1038_v20 = vadd.f32 %v2242_v45, %v967_v16  ;;  %v1070_v23 = vadd.f32 %v2242_v45, %v999_v19  ;;  %v968_v24 = vmul.f32 %v1717_v14, %v2237_v41 }
 0x101   :  { %1841 = vpow2.f32 %v1625_v9  ;;  %v1000_v25 = vmul.f32 %v1749_v15, %v2237_v41  ;;  %v1036_v27 = vadd.f32 %v2242_v45, %v965_v21  ;;  %v1068_v28 = vadd.f32 %v2242_v45, %v997_v22 }
 0x102   :  { %1843 = vpow2.f32 %v1591_v12  ;;  %v1596_v26 = vmul.f32 -1.442695, %v1038_v20  ;;  %v1628_v29 = vmul.f32 -1.442695, %v1070_v23  ;;  %v1039_v30 = vadd.f32 %v2242_v45, %v968_v24 }
 0x103   :  { %1845 = vpow2.f32 %v1623_v13  ;;  %v1594_v33 = vmul.f32 -1.442695, %v1036_v27  ;;  %v1626_v34 = vmul.f32 -1.442695, %v1068_v28  ;;  %v1071_v42 = vadd.f32 %v2242_v45, %v1000_v25 }
 0x104   :  { %1847 = vpow2.f32 %v1596_v26  ;;  %v1597_v37 = vmul.f32 -1.442695, %v1039_v30  ;;  %v966_v43 = vmul.f32 %v2237_v41, %v523_v17  ;;  %v998_v49 = vmul.f32 %v2237_v41, %v651_v18 }
 0x105   :  { %v1720_v31 = vpop.f32.mrb[8].mxu0  ;;  %v1752_v32 = vpop.f32.mrb[8].mxu1  ;;  %1849 = vpow2.f32 %v1628_v29  ;;  %v1629_v61 = vmul.f32 -1.442695, %v1071_v42 }
 0x106   :  { %v536_v35 = vpop.f32.mrb[9].mxu0  ;;  %v664_v36 = vpop.f32.mrb[9].mxu1  ;;  %1851 = vpow2.f32 %v1594_v33  ;;  %v1037_v52 = vadd.f32 %v2242_v45, %v966_v43  ;;  %v971_v53 = vmul.f32 %v1720_v31, %v2237_v41  ;;  %v1069_v58 = vadd.f32 %v2242_v45, %v998_v49 }
 0x107   :  { %v2271_v38 = vpop.f32.mrb[10].mxu0  ;;  %v2273_v39 = vpop.f32.mrb[10].mxu1  ;;  %1853 = vpow2.f32 %v1626_v34  ;;  %v1003_v62 = vmul.f32 %v1752_v32, %v2237_v41  ;;  %v969_v9 = vmul.f32 %v2237_v41, %v536_v35  ;;  %v1001_v23 = vmul.f32 %v2237_v41, %v664_v36 }
 0x108   :  { %v1832_v40 = vpop.eup %1831  ;;  %v2277_v44 = vpop.f32.mrb[11].mxu0  ;;  %1855 = vpow2.f32 %v1597_v37  ;;  %v2290_v3 = vmul.f32 -1.442695, %v1037_v52  ;;  %v1042_v4 = vadd.f32 %v2242_v45, %v971_v53  ;;  %v1627_v14 = vmul.f32 -1.442695, %v1069_v58 }
 0x109   :  { %v2279_v46 = vpop.f32.mrb[11].mxu1  ;;  %v1834_v47 = vpop.eup %1833  ;;  %v1290_v48 = vadd.f32 1.0, %v1832_v40  ;;  %v1074_v19 = vadd.f32 %v2242_v45, %v1003_v62  ;;  %v1040_v26 = vadd.f32 %v2242_v45, %v969_v9  ;;  %v972_v27 = vmul.f32 %v2271_v38, %v2237_v41 }
 0x10a   :  { %v1836_v50 = vpop.eup %1835  ;;  %v1322_v51 = vadd.f32 1.0, %v1834_v47  ;;  %v1600_v22 = vmul.f32 -1.442695, %v1042_v4  ;;  %v1004_v30 = vmul.f32 %v2273_v39, %v2237_v41  ;;  %v1072_v37 = vadd.f32 %v2242_v45, %v1001_v23 }
 0x10b   :  { %v1838_v54 = vpop.eup %1837  ;;  %1857 = vrcp.f32 %v1290_v48  ;;  %v1288_v55 = vadd.f32 1.0, %v1836_v50  ;;  %v1632_v33 = vmul.f32 -1.442695, %v1074_v19  ;;  %v970_v38 = vmul.f32 %v2237_v41, %v2277_v44 }
 0x10c   :  { %v1840_v56 = vpop.eup %1839  ;;  %1859 = vrcp.f32 %v1322_v51  ;;  %v1320_v57 = vadd.f32 1.0, %v1838_v54  ;;  %v1043_v43 = vadd.f32 %v2242_v45, %v972_v27  ;;  %v1598_v44 = vmul.f32 -1.442695, %v1040_v26 }
 0x10d   :  { %v1842_v59 = vpop.eup %1841  ;;  %1861 = vrcp.f32 %v1288_v55  ;;  %v1291_v60 = vadd.f32 1.0, %v1840_v56  ;;  %v2286_v63 = vpop.f32.mrb[12].mxu0  ;;  %v1075_v50 = vadd.f32 %v2242_v45, %v1004_v30  ;;  %v1002_v51 = vmul.f32 %v2237_v41, %v2279_v46 }
 0x10e   :  { %v2288_v0 = vpop.f32.mrb[12].mxu1  ;;  %v1844_v1 = vpop.eup %1843  ;;  %1863 = vrcp.f32 %v1320_v57  ;;  %v1323_v2 = vadd.f32 1.0, %v1842_v59  ;;  %v1041_v55 = vadd.f32 %v2242_v45, %v970_v38  ;;  %v975_v56 = vmul.f32 %v2286_v63, %v2237_v41 }
 0x10f   :  { %v2293_v5 = vpop.f32.mrb[13].mxu0  ;;  %v2295_v6 = vpop.f32.mrb[13].mxu1  ;;  %1865 = vrcp.f32 %v1291_v60  ;;  %v1289_v8 = vadd.f32 1.0, %v1844_v1  ;;  %v1007_v57 = vmul.f32 %v2288_v0, %v2237_v41  ;;  %v1630_v58 = vmul.f32 -1.442695, %v1072_v37 }
 0x110   :  { %v1846_v7 = vpop.eup %1845  ;;  %v2298_v10 = vpop.f32.mrb[14].mxu0  ;;  %1867 = vrcp.f32 %v1323_v2  ;;  %v1073_v59 = vadd.f32 %v2242_v45, %v1002_v51  ;;  %v1046_v62 = vadd.f32 %v2242_v45, %v975_v56  ;;  %v1633_v0 = vmul.f32 -1.442695, %v1075_v50 }
 0x111   :  { %v2300_v11 = vpop.f32.mrb[14].mxu1  ;;  %v1848_v12 = vpop.eup %1847  ;;  %v1321_v13 = vadd.f32 1.0, %v1846_v7  ;;  %1869 = vrcp.f32 %v1289_v8  ;;  %v1078_v1 = vadd.f32 %v2242_v45, %v1007_v57  ;;  %v1005_v19 = vmul.f32 %v2237_v41, %v2295_v6 }
 0x112   :  { %v2302_v15 = vpop.f32.mrb[15].mxu0  ;;  %v2304_v16 = vpop.f32.mrb[15].mxu1  ;;  %v1294_v18 = vadd.f32 1.0, %v1848_v12  ;;  %v1631_v9 = vmul.f32 -1.442695, %v1073_v59  ;;  %v973_v12 = vmul.f32 %v2237_v41, %v2293_v5 }
 0x113   :  { %v1850_v17 = vpop.eup %1849  ;;  %1871 = vrcp.f32 %v1321_v13  ;;  %v1636_v5 = vmul.f32 -1.442695, %v1078_v1 }
 0x114   :  { %v1852_v20 = vpop.eup %1851  ;;  %v1326_v21 = vadd.f32 1.0, %v1850_v17  ;;  %1873 = vrcp.f32 %v1294_v18  ;;  %v1604_v18 = vmul.f32 -1.442695, %v1046_v62  ;;  %v1044_v26 = vadd.f32 %v2242_v45, %v973_v12 }
 0x115   :  { %v1854_v24 = vpop.eup %1853  ;;  %v1292_v25 = vadd.f32 1.0, %v1852_v20  ;;  %v2313_v34 = vpop.f32.mrb[16].mxu0 }
 0x116   :  { %v1856_v28 = vpop.eup %1855  ;;  %1875 = vrcp.f32 %v1326_v21  ;;  %v1324_v29 = vadd.f32 1.0, %v1854_v24  ;;  %v2315_v35 = vpop.f32.mrb[16].mxu1 }
 0x117   :  { %v1858_v31 = vpop.eup %1857  ;;  %1877 = vrcp.f32 %v1292_v25  ;;  %v1295_v32 = vadd.f32 1.0, %v1856_v28  ;;  %v2323_v39 = vpop.f32.mrb[17].mxu0 }
 0x118   :  { %v1860_v36 = vpop.eup %1859  ;;  %1482 = vst [vmem:[%s2719_s4 + $0x10] sm:$0xff] %v1858_v31  ;;  %1879 = vrcp.f32 %v1324_v29  ;;  %v2325_v40 = vpop.f32.mrb[17].mxu1  ;;  %v1076_v29 = vadd.f32 %v2242_v45, %v1005_v19 }
 0x119   :  { %v1862_v42 = vpop.eup %1861  ;;  %1514 = vst [vmem:[%s2719_s4 + $0x110] sm:$0xff] %v1860_v36  ;;  %1881 = vrcp.f32 %v1295_v32  ;;  %v2331_v47 = vpop.f32.mrb[18].mxu0  ;;  %v976_v32 = vmul.f32 %v2298_v10, %v2237_v41 }
 0x11a   :  { %v2333_v48 = vpop.f32.mrb[18].mxu1  ;;  %v1864_v49 = vpop.eup %1863  ;;  %1480 = vst [vmem:[%s2719_s4] sm:$0xff] %v1862_v42  ;;  %1883 = vpow2.f32 %v1629_v61  ;;  %v1601_v61 = vmul.f32 -1.442695, %v1043_v43  ;;  %v2410_v43 = vmul.f32 -1.442695, %v1044_v26 }
 0x11b   :  { %v2341_v52 = vpop.f32.mrb[19].mxu0  ;;  %v2343_v53 = vpop.f32.mrb[19].mxu1  ;;  %1512 = vst [vmem:[%s2719_s4 + $0x100] sm:$0xff] %v1864_v49  ;;  %1885 = vpow2.f32 %v2290_v3  ;;  %v1599_v3 = vmul.f32 -1.442695, %v1041_v55  ;;  %v1008_v49 = vmul.f32 %v2300_v11, %v2237_v41  ;;  %v974_v11 = vmul.f32 %v2237_v41, %v2302_v15 }
 0x11c   :  { %v1866_v54 = vpop.eup %1865  ;;  %1887 = vpow2.f32 %v1627_v14 }
 0x11d   :  { %v1868_v46 = vpop.eup %1867  ;;  %1483 = vst [vmem:[%s2719_s4 + $0x18] sm:$0xff] %v1866_v54  ;;  %1889 = vpow2.f32 %v1600_v22  ;;  %v2369_v4 = vpop.f32.mrb[20].mxu0  ;;  %v2418_v54 = vmul.f32 -1.442695, %v1076_v29 }
 0x11e   :  { %v1870_v60 = vpop.eup %1869  ;;  %1515 = vst [vmem:[%s2719_s4 + $0x118] sm:$0xff] %v1868_v46  ;;  %1891 = vpow2.f32 %v1632_v33  ;;  %v2371_v7 = vpop.f32.mrb[20].mxu1 }
 0x11f   :  { %v1872_v63 = vpop.eup %1871  ;;  %1481 = vst [vmem:[%s2719_s4 + $0x8] sm:$0xff] %v1870_v60  ;;  %1893 = vpow2.f32 %v1598_v44  ;;  %v2378_v13 = vpop.f32.mrb[21].mxu0 }
 0x120   :  { %v1874_v2 = vpop.eup %1873  ;;  %1513 = vst [vmem:[%s2719_s4 + $0x108] sm:$0xff] %v1872_v63  ;;  %1895 = vpow2.f32 %v1630_v58  ;;  %v2380_v14 = vpop.f32.mrb[21].mxu1  ;;  %v1047_v58 = vadd.f32 %v2242_v45, %v976_v32  ;;  %v1006_v63 = vmul.f32 %v2237_v41, %v2304_v16 }
 0x121   :  { %v1876_v8 = vpop.eup %1875  ;;  %1486 = vst [vmem:[%s2719_s4 + $0x30] sm:$0xff] %v1874_v2  ;;  %1897 = vpow2.f32 %v1601_v61  ;;  %v2387_v20 = vpop.f32.mrb[22].mxu0 }
 0x122   :  { %v1878_v17 = vpop.eup %1877  ;;  %1518 = vst [vmem:[%s2719_s4 + $0x130] sm:$0xff] %v1876_v8  ;;  %v2389_v21 = vpop.f32.mrb[22].mxu1  ;;  %1899 = vpow2.f32 %v1633_v0  ;;  %v1077_v26 = vadd.f32 %v2242_v45, %v1006_v63 }
 0x123   :  { %v1880_v22 = vpop.eup %1879  ;;  %1484 = vst [vmem:[%s2719_s4 + $0x20] sm:$0xff] %v1878_v17  ;;  %v2394_v23 = vpop.f32.mrb[23].mxu0  ;;  %1901 = vpow2.f32 %v1599_v3  ;;  %v1079_v3 = vadd.f32 %v2242_v45, %v1008_v49 }
 0x124   :  { %v2396_v24 = vpop.f32.mrb[23].mxu1  ;;  %v1882_v25 = vpop.eup %1881  ;;  %1516 = vst [vmem:[%s2719_s4 + $0x120] sm:$0xff] %v1880_v22  ;;  %1903 = vpow2.f32 %v1631_v9  ;;  %v979_v9 = vmul.f32 %v2313_v34, %v2237_v41  ;;  %v1011_v22 = vmul.f32 %v2315_v35, %v2237_v41  ;;  %v977_v34 = vmul.f32 %v2237_v41, %v2323_v39 }
 0x125   :  { %v1884_v6 = vpop.eup %1883  ;;  %1487 = vst [vmem:[%s2719_s4 + $0x38] sm:$0xff] %v1882_v25  ;;  %1905 = vpow2.f32 %v1604_v18  ;;  %v2408_v37 = vpop.f32.mrb[24].mxu0  ;;  %v1045_v18 = vadd.f32 %v2242_v45, %v974_v11  ;;  %v1009_v35 = vmul.f32 %v2237_v41, %v2325_v40  ;;  %v1605_v39 = vmul.f32 -1.442695, %v1047_v58 }
 0x126   :  { %v1886_v27 = vpop.eup %1885  ;;  %v1327_v28 = vadd.f32 1.0, %v1884_v6  ;;  %1907 = vpow2.f32 %v1636_v5  ;;  %v2414_v44 = vpop.f32.mrb[24].mxu1  ;;  %v1048_v11 = vadd.f32 %v2242_v45, %v977_v34 }
 0x127   :  { %v1888_v30 = vpop.eup %1887  ;;  %v1293_v31 = vadd.f32 1.0, %v1886_v27  ;;  %v2416_v50 = vpop.f32.mrb[25].mxu0  ;;  %v1080_v63 = vadd.f32 %v2242_v45, %v1009_v35 }
 0x128   :  { %v1890_v33 = vpop.eup %1889  ;;  %1909 = vrcp.f32 %v1327_v28  ;;  %v1325_v36 = vadd.f32 1.0, %v1888_v30  ;;  %v2420_v55 = vpop.f32.mrb[25].mxu1 }
 0x129   :  { %v1892_v38 = vpop.eup %1891  ;;  %1911 = vrcp.f32 %v1293_v31  ;;  %v1298_v42 = vadd.f32 1.0, %v1890_v33  ;;  %v2422_v56 = vpop.f32.mrb[26].mxu0 }
 0x12a   :  { %v1894_v51 = vpop.eup %1893  ;;  %1913 = vrcp.f32 %v1325_v36  ;;  %v1330_v10 = vadd.f32 1.0, %v1892_v38  ;;  %v2427_v59 = vpop.f32.mrb[26].mxu1  ;;  %v1050_v36 = vadd.f32 %v2242_v45, %v979_v9  ;;  %v980_v38 = vmul.f32 %v2331_v47, %v2237_v41 }
 0x12b   :  { %v1896_v57 = vpop.eup %1895  ;;  %1915 = vrcp.f32 %v1298_v42  ;;  %v1296_v46 = vadd.f32 1.0, %v1894_v51  ;;  %v2429_v60 = vpop.f32.mrb[27].mxu0  ;;  %v1637_v51 = vmul.f32 -1.442695, %v1079_v3  ;;  %v1603_v47 = vmul.f32 -1.442695, %v1045_v18 }
 0x12c   :  { %v1898_v61 = vpop.eup %1897  ;;  %1917 = vrcp.f32 %v1330_v10  ;;  %v1328_v62 = vadd.f32 1.0, %v1896_v57  ;;  %v2433_v0 = vpop.f32.mrb[27].mxu1  ;;  %v1082_v10 = vadd.f32 %v2242_v45, %v1011_v22  ;;  %v1012_v57 = vmul.f32 %v2333_v48, %v2237_v41 }
 0x12d   :  { %v1900_v1 = vpop.eup %1899  ;;  %1919 = vrcp.f32 %v1296_v46  ;;  %v1299_v2 = vadd.f32 1.0, %v1898_v61  ;;  %v2441_v5 = vpop.f32.mrb[28].mxu0  ;;  %v978_v61 = vmul.f32 %v2237_v41, %v2341_v52  ;;  %v1635_v48 = vmul.f32 -1.442695, %v1077_v26 }
 0x12e   :  { %v1902_v8 = vpop.eup %1901  ;;  %1921 = vrcp.f32 %v1328_v62  ;;  %v1331_v15 = vadd.f32 1.0, %v1900_v1  ;;  %v2446_v27 = vpop.f32.mrb[28].mxu1  ;;  %v1640_v3 = vmul.f32 -1.442695, %v1082_v10 }
 0x12f   :  { %v1904_v12 = vpop.eup %1903  ;;  %1923 = vrcp.f32 %v1299_v2  ;;  %v1297_v17 = vadd.f32 1.0, %v1902_v8  ;;  %v2448_v28 = vpop.f32.mrb[29].mxu0  ;;  %v1051_v2 = vadd.f32 %v2242_v45, %v980_v38  ;;  %v1049_v9 = vadd.f32 %v2242_v45, %v978_v61 }
 0x130   :  { %v1906_v19 = vpop.eup %1905  ;;  %1925 = vrcp.f32 %v1331_v15  ;;  %v1329_v16 = vadd.f32 1.0, %v1904_v12  ;;  %v2452_v31 = vpop.f32.mrb[29].mxu1  ;;  %v1606_v15 = vmul.f32 -1.442695, %v1048_v11 }
 0x131   :  { %v1908_v25 = vpop.eup %1907  ;;  %1927 = vrcp.f32 %v1297_v17  ;;  %v1302_v6 = vadd.f32 1.0, %v1906_v19  ;;  %v2454_v32 = vpop.f32.mrb[30].mxu0  ;;  %v1638_v17 = vmul.f32 -1.442695, %v1080_v63  ;;  %v1609_v19 = vmul.f32 -1.442695, %v1051_v2 }
 0x132   :  { %v1910_v29 = vpop.eup %1909  ;;  %1929 = vrcp.f32 %v1329_v16  ;;  %v1334_v30 = vadd.f32 1.0, %v1908_v25  ;;  %v2462_v42 = vpop.f32.mrb[30].mxu1  ;;  %v1010_v25 = vmul.f32 %v2237_v41, %v2343_v53  ;;  %v1607_v26 = vmul.f32 -1.442695, %v1049_v9 }
 0x133   :  { %v1912_v33 = vpop.eup %1911  ;;  %1519 = vst [vmem:[%s2719_s4 + $0x138] sm:$0xff] %v1910_v29  ;;  %1931 = vrcp.f32 %v1302_v6  ;;  %v2464_v49 = vpop.f32.mrb[31].mxu0  ;;  %v983_v29 = vmul.f32 %v2369_v4, %v2237_v41  ;;  %v1015_v53 = vmul.f32 %v2371_v7, %v2237_v41  ;;  %v981_v4 = vmul.f32 %v2237_v41, %v2378_v13 }
 0x134   :  { %v1914_v40 = vpop.eup %1913  ;;  %1485 = vst [vmem:[%s2719_s4 + $0x28] sm:$0xff] %v1912_v33  ;;  %1933 = vrcp.f32 %v1334_v30  ;;  %v2472_v46 = vpop.f32.mrb[31].mxu1 }
 0x135   :  { %v1916_v58 = vpop.eup %1915  ;;  %1517 = vst [vmem:[%s2719_s4 + $0x128] sm:$0xff] %v1914_v40  ;;  %1935 = vpow2.f32 %v2410_v43  ;;  %v1608_v43 = vmul.f32 -1.442695, %v1050_v36  ;;  %v1054_v10 = vadd.f32 %v2242_v45, %v983_v29  ;;  %v1086_v7 = vadd.f32 %v2242_v45, %v1015_v53 }
 0x136   :  { %v1918_v62 = vpop.eup %1917  ;;  %1490 = vst [vmem:[%s2719_s4 + $0x50] sm:$0xff] %v1916_v58  ;;  %1937 = vpow2.f32 %v2418_v54  ;;  %v1083_v54 = vadd.f32 %v2242_v45, %v1012_v57  ;;  %v1052_v63 = vadd.f32 %v2242_v45, %v981_v4 }
 0x137   :  { %v1920_v1 = vpop.eup %1919  ;;  %1522 = vst [vmem:[%s2719_s4 + $0x150] sm:$0xff] %v1918_v62  ;;  %1939 = vpow2.f32 %v1605_v39  ;;  %v1081_v39 = vadd.f32 %v2242_v45, %v1010_v25  ;;  %v1612_v2 = vmul.f32 -1.442695, %v1054_v10 }
 0x138   :  { %v1922_v52 = vpop.eup %1921  ;;  %1488 = vst [vmem:[%s2719_s4 + $0x40] sm:$0xff] %v1920_v1  ;;  %1941 = vpow2.f32 %v1637_v51  ;;  %v1641_v22 = vmul.f32 -1.442695, %v1083_v54 }
 0x139   :  { %v1924_v8 = vpop.eup %1923  ;;  %1520 = vst [vmem:[%s2719_s4 + $0x140] sm:$0xff] %v1922_v52  ;;  %1943 = vpow2.f32 %v1603_v47  ;;  %v1013_v47 = vmul.f32 %v2237_v41, %v2380_v14  ;;  %v1639_v62 = vmul.f32 -1.442695, %v1081_v39 }
 0x13a   :  { %v1926_v12 = vpop.eup %1925  ;;  %1491 = vst [vmem:[%s2719_s4 + $0x58] sm:$0xff] %v1924_v8  ;;  %1945 = vpow2.f32 %v1635_v48 }
 0x13b   :  { %v1928_v18 = vpop.eup %1927  ;;  %1523 = vst [vmem:[%s2719_s4 + $0x158] sm:$0xff] %v1926_v12  ;;  %1947 = vpow2.f32 %v1608_v43  ;;  %v1084_v54 = vadd.f32 %v2242_v45, %v1013_v47 }
 0x13c   :  { %v1930_v16 = vpop.eup %1929  ;;  %1489 = vst [vmem:[%s2719_s4 + $0x48] sm:$0xff] %v1928_v18  ;;  %1949 = vpow2.f32 %v1640_v3 }
 0x13d   :  { %v1932_v6 = vpop.eup %1931  ;;  %1521 = vst [vmem:[%s2719_s4 + $0x148] sm:$0xff] %v1930_v16  ;;  %1951 = vpow2.f32 %v1606_v15  ;;  %v984_v15 = vmul.f32 %v2387_v20, %v2237_v41  ;;  %v982_v16 = vmul.f32 %v2237_v41, %v2394_v23  ;;  %v1644_v23 = vmul.f32 -1.442695, %v1086_v7 }
 0x13e   :  { %v1934_v34 = vpop.eup %1933  ;;  %1494 = vst [vmem:[%s2719_s4 + $0x70] sm:$0xff] %v1932_v6  ;;  %1953 = vpow2.f32 %v1638_v17  ;;  %v1016_v17 = vmul.f32 %v2389_v21, %v2237_v41  ;;  %v1014_v6 = vmul.f32 %v2237_v41, %v2396_v24  ;;  %v987_v21 = vmul.f32 %v2408_v37, %v2237_v41 }
 0x13f   :  { %v1936_v30 = vpop.eup %1935  ;;  %1526 = vst [vmem:[%s2719_s4 + $0x170] sm:$0xff] %v1934_v34  ;;  %1955 = vpow2.f32 %v1609_v19  ;;  %v1055_v34 = vadd.f32 %v2242_v45, %v984_v15  ;;  %v1019_v24 = vmul.f32 %v2414_v44, %v2237_v41  ;;  %v1053_v37 = vadd.f32 %v2242_v45, %v982_v16 }
 0x140   :  { %v1938_v35 = vpop.eup %1937  ;;  %v1300_v33 = vadd.f32 1.0, %v1936_v30  ;;  %1957 = vpow2.f32 %v1641_v22  ;;  %v1087_v30 = vadd.f32 %v2242_v45, %v1016_v17  ;;  %v1085_v44 = vadd.f32 %v2242_v45, %v1014_v6 }
 0x141   :  { %v1940_v36 = vpop.eup %1939  ;;  %v1332_v38 = vadd.f32 1.0, %v1938_v35  ;;  %1959 = vpow2.f32 %v1607_v26  ;;  %v1610_v35 = vmul.f32 -1.442695, %v1052_v63 }
 0x142   :  { %v1942_v40 = vpop.eup %1941  ;;  %1961 = vrcp.f32 %v1300_v33  ;;  %v1303_v51 = vadd.f32 1.0, %v1940_v36  ;;  %v985_v33 = vmul.f32 %v2237_v41, %v2416_v50  ;;  %v1642_v36 = vmul.f32 -1.442695, %v1084_v54 }
 0x143   :  { %v1944_v57 = vpop.eup %1943  ;;  %1963 = vrcp.f32 %v1332_v38  ;;  %v1335_v58 = vadd.f32 1.0, %v1942_v40  ;;  %v1017_v38 = vmul.f32 %v2237_v41, %v2420_v55  ;;  %v1613_v40 = vmul.f32 -1.442695, %v1055_v34 }
 0x144   :  { %v1946_v11 = vpop.eup %1945  ;;  %1965 = vrcp.f32 %v1303_v51  ;;  %v1301_v61 = vadd.f32 1.0, %v1944_v57  ;;  %v1058_v50 = vadd.f32 %v2242_v45, %v987_v21  ;;  %v1645_v10 = vmul.f32 -1.442695, %v1087_v30 }
 0x145   :  { %v1948_v48 = vpop.eup %1947  ;;  %1967 = vrcp.f32 %v1335_v58  ;;  %v1333_v13 = vadd.f32 1.0, %v1946_v11  ;;  %v1090_v57 = vadd.f32 %v2242_v45, %v1019_v24  ;;  %v1611_v55 = vmul.f32 -1.442695, %v1053_v37 }
 0x146   :  { %v1950_v1 = vpop.eup %1949  ;;  %1969 = vrcp.f32 %v1301_v61  ;;  %v1306_v43 = vadd.f32 1.0, %v1948_v48  ;;  %v1056_v7 = vadd.f32 %v2242_v45, %v985_v33  ;;  %v1643_v11 = vmul.f32 -1.442695, %v1085_v44 }
 0x147   :  { %v1952_v52 = vpop.eup %1951  ;;  %1971 = vrcp.f32 %v1333_v13  ;;  %v1338_v3 = vadd.f32 1.0, %v1950_v1  ;;  %v1088_v61 = vadd.f32 %v2242_v45, %v1017_v38  ;;  %v1616_v48 = vmul.f32 -1.442695, %v1058_v50 }
 0x148   :  { %v1954_v8 = vpop.eup %1953  ;;  %1973 = vrcp.f32 %v1306_v43  ;;  %v1304_v14 = vadd.f32 1.0, %v1952_v52  ;;  %v1648_v63 = vmul.f32 -1.442695, %v1090_v57  ;;  %v988_v1 = vmul.f32 %v2422_v56, %v2237_v41 }
 0x149   :  { %v1956_v9 = vpop.eup %1955  ;;  %1975 = vrcp.f32 %v1338_v3  ;;  %v1336_v12 = vadd.f32 1.0, %v1954_v8  ;;  %v1614_v45 = vmul.f32 -1.442695, %v1056_v7  ;;  %v1646_v41 = vmul.f32 -1.442695, %v1088_v61 }
 0x14a   :  { %v1958_v18 = vpop.eup %1957  ;;  %1977 = vrcp.f32 %v1304_v14  ;;  %v1307_v19 = vadd.f32 1.0, %v1956_v9 }
 0x14b   :  { %v1960_v22 = vpop.eup %1959  ;;  %1979 = vrcp.f32 %v1336_v12  ;;  %v1339_v25 = vadd.f32 1.0, %v1958_v18 }
 0x14c   :  { %v1962_v26 = vpop.eup %1961  ;;  %1981 = vrcp.f32 %v1307_v19  ;;  %v1305_v20 = vadd.f32 1.0, %v1960_v22 }
 0x14d   :  { %v1964_v29 = vpop.eup %1963  ;;  %1492 = vst [vmem:[%s2719_s4 + $0x60] sm:$0xff] %v1962_v26  ;;  %1983 = vrcp.f32 %v1339_v25 }
 0x14e   :  { %v1966_v53 = vpop.eup %1965  ;;  %1524 = vst [vmem:[%s2719_s4 + $0x160] sm:$0xff] %v1964_v29  ;;  %1985 = vrcp.f32 %v1305_v20 }
 0x14f   :  { %v1968_v39 = vpop.eup %1967  ;;  %1495 = vst [vmem:[%s2719_s4 + $0x78] sm:$0xff] %v1966_v53  ;;  %1987 = vpow2.f32 %v1639_v62 }
 0x150   :  { %v1970_v4 = vpop.eup %1969  ;;  %1527 = vst [vmem:[%s2719_s4 + $0x178] sm:$0xff] %v1968_v39  ;;  %1989 = vpow2.f32 %v1612_v2  ;;  %v2590_v2 = vld [vmem:[%s2717_s2] ss:$0 sm:$0xff] }
 0x151   :  { %v1972_v51 = vpop.eup %1971  ;;  %1493 = vst [vmem:[%s2719_s4 + $0x68] sm:$0xff] %v1970_v4  ;;  %1991 = vpow2.f32 %v1644_v23  ;;  %v1020_v52 = vmul.f32 %v2590_v2, %v2427_v59  ;;  %v2606_v59 = vld [vmem:[%s2718_s3] ss:$0 sm:$0xff]  ;;  %v986_v18 = vmul.f32 %v2590_v2, %v2429_v60  ;;  %v1018_v22 = vmul.f32 %v2590_v2, %v2433_v0 }
 0x152   :  { %v1974_v58 = vpop.eup %1973  ;;  %1525 = vst [vmem:[%s2719_s4 + $0x168] sm:$0xff] %v1972_v51  ;;  %1993 = vpow2.f32 %v1610_v35  ;;  %v1059_v8 = vadd.f32 %v2606_v59, %v988_v1  ;;  %v991_v37 = vmul.f32 %v2590_v2, %v2441_v5  ;;  %v989_v4 = vmul.f32 %v2590_v2, %v2448_v28 }
 0x153   :  { %v1976_v47 = vpop.eup %1975  ;;  %1498 = vst [vmem:[%s2719_s4 + $0x90] sm:$0xff] %v1974_v58  ;;  %1995 = vpow2.f32 %v1642_v36  ;;  %v1091_v9 = vadd.f32 %v2606_v59, %v1020_v52  ;;  %v1057_v30 = vadd.f32 %v2606_v59, %v986_v18  ;;  %v1089_v53 = vadd.f32 %v2606_v59, %v1018_v22 }
 0x154   :  { %v1978_v62 = vpop.eup %1977  ;;  %1530 = vst [vmem:[%s2719_s4 + $0x190] sm:$0xff] %v1976_v47  ;;  %1997 = vpow2.f32 %v1613_v40  ;;  %v1617_v26 = vmul.f32 -1.442695, %v1059_v8  ;;  %v1023_v36 = vmul.f32 %v2590_v2, %v2446_v27  ;;  %v1021_v51 = vmul.f32 %v2590_v2, %v2452_v31 }
 0x155   :  { %v1980_v13 = vpop.eup %1979  ;;  %1496 = vst [vmem:[%s2719_s4 + $0x80] sm:$0xff] %v1978_v62  ;;  %1999 = vpow2.f32 %v1645_v10  ;;  %v1649_v21 = vmul.f32 -1.442695, %v1091_v9  ;;  %v1062_v57 = vadd.f32 %v2606_v59, %v991_v37  ;;  %v992_v27 = vmul.f32 %v2590_v2, %v2454_v32 }
 0x156   :  { %v1982_v43 = vpop.eup %1981  ;;  %1528 = vst [vmem:[%s2719_s4 + $0x180] sm:$0xff] %v1980_v13  ;;  %2001 = vpow2.f32 %v1611_v55  ;;  %v1094_v7 = vadd.f32 %v2606_v59, %v1023_v36  ;;  %v1024_v28 = vmul.f32 %v2590_v2, %v2462_v42  ;;  %v1615_v31 = vmul.f32 -1.442695, %v1057_v30 }
 0x157   :  { %v1984_v3 = vpop.eup %1983  ;;  %1499 = vst [vmem:[%s2719_s4 + $0x98] sm:$0xff] %v1982_v43  ;;  %2003 = vpow2.f32 %v1643_v11  ;;  %v1060_v11 = vadd.f32 %v2606_v59, %v989_v4  ;;  %v990_v32 = vmul.f32 %v2590_v2, %v2464_v49  ;;  %v1647_v62 = vmul.f32 -1.442695, %v1089_v53 }
 0x158   :  { %v1986_v56 = vpop.eup %1985  ;;  %1531 = vst [vmem:[%s2719_s4 + $0x198] sm:$0xff] %v1984_v3  ;;  %2005 = vpow2.f32 %v1616_v48  ;;  %v1092_v42 = vadd.f32 %v2606_v59, %v1021_v51  ;;  %v1022_v48 = vmul.f32 %v2590_v2, %v2472_v46  ;;  %v1063_v49 = vadd.f32 %v2606_v59, %v992_v27 }
 0x159   :  { %v1988_v54 = vpop.eup %1987  ;;  %1497 = vst [vmem:[%s2719_s4 + $0x88] sm:$0xff] %v1986_v56  ;;  %2007 = vpow2.f32 %v1648_v63  ;;  %v1620_v63 = vmul.f32 -1.442695, %v1062_v57  ;;  %v1652_v43 = vmul.f32 -1.442695, %v1094_v7  ;;  %v1061_v2 = vadd.f32 %v2606_v59, %v990_v32 }
 0x15a   :  { %v1990_v14 = vpop.eup %1989  ;;  %v1337_v15 = vadd.f32 1.0, %v1988_v54  ;;  %2009 = vpow2.f32 %v1614_v45  ;;  %v1095_v45 = vadd.f32 %v2606_v59, %v1024_v28  ;;  %v1618_v46 = vmul.f32 -1.442695, %v1060_v11 }
 0x15b   :  { %v1992_v12 = vpop.eup %1991  ;;  %v1310_v17 = vadd.f32 1.0, %v1990_v14  ;;  %2011 = vpow2.f32 %v1646_v41  ;;  %v1650_v41 = vmul.f32 -1.442695, %v1092_v42  ;;  %v1093_v56 = vadd.f32 %v2606_v59, %v1022_v48 }
 0x15c   :  { %v1994_v19 = vpop.eup %1993  ;;  %2013 = vrcp.f32 %v1337_v15  ;;  %v1342_v16 = vadd.f32 1.0, %v1992_v12  ;;  %v1621_v8 = vmul.f32 -1.442695, %v1063_v49  ;;  %v1653_v15 = vmul.f32 -1.442695, %v1095_v45 }
 0x15d   :  { %v1996_v25 = vpop.eup %1995  ;;  %2015 = vrcp.f32 %v1310_v17  ;;  %v1308_v6 = vadd.f32 1.0, %v1994_v19  ;;  %v1619_v59 = vmul.f32 -1.442695, %v1061_v2  ;;  %v1651_v17 = vmul.f32 -1.442695, %v1093_v56 }
 0x15e   :  { %v1998_v20 = vpop.eup %1997  ;;  %2017 = vrcp.f32 %v1342_v16  ;;  %v1340_v34 = vadd.f32 1.0, %v1996_v25 }
 0x15f   :  { %v2000_v29 = vpop.eup %1999  ;;  %2019 = vrcp.f32 %v1308_v6  ;;  %v1311_v23 = vadd.f32 1.0, %v1998_v20 }
 0x160   :  { %v2002_v60 = vpop.eup %2001  ;;  %2021 = vrcp.f32 %v1340_v34  ;;  %v1343_v24 = vadd.f32 1.0, %v2000_v29 }
 0x161   :  { %v2004_v35 = vpop.eup %2003  ;;  %2023 = vrcp.f32 %v1311_v23  ;;  %v1309_v0 = vadd.f32 1.0, %v2002_v60 }
 0x162   :  { %v2006_v33 = vpop.eup %2005  ;;  %2025 = vrcp.f32 %v1343_v24  ;;  %v1341_v39 = vadd.f32 1.0, %v2004_v35 }
 0x163   :  { %v2008_v44 = vpop.eup %2007  ;;  %2027 = vrcp.f32 %v1309_v0  ;;  %v1314_v38 = vadd.f32 1.0, %v2006_v33 }
 0x164   :  { %v2010_v40 = vpop.eup %2009  ;;  %2029 = vrcp.f32 %v1341_v39  ;;  %v1346_v50 = vadd.f32 1.0, %v2008_v44 }
 0x165   :  { %v2012_v10 = vpop.eup %2011  ;;  %2031 = vrcp.f32 %v1314_v38  ;;  %v1312_v5 = vadd.f32 1.0, %v2010_v40 }
 0x166   :  { %v2014_v58 = vpop.eup %2013  ;;  %2033 = vrcp.f32 %v1346_v50  ;;  %v1344_v55 = vadd.f32 1.0, %v2012_v10 }
 0x167   :  { %v2016_v47 = vpop.eup %2015  ;;  %1529 = vst [vmem:[%s2719_s4 + $0x188] sm:$0xff] %v2014_v58  ;;  %2035 = vrcp.f32 %v1312_v5 }
 0x168   :  { %v2018_v61 = vpop.eup %2017  ;;  %1502 = vst [vmem:[%s2719_s4 + $0xb0] sm:$0xff] %v2016_v47  ;;  %2037 = vrcp.f32 %v1344_v55 }
 0x169   :  { %v2020_v13 = vpop.eup %2019  ;;  %1534 = vst [vmem:[%s2719_s4 + $0x1b0] sm:$0xff] %v2018_v61  ;;  %2039 = vpow2.f32 %v1617_v26 }
 0x16a   :  { %v2022_v1 = vpop.eup %2021  ;;  %1500 = vst [vmem:[%s2719_s4 + $0xa0] sm:$0xff] %v2020_v13  ;;  %2041 = vpow2.f32 %v1649_v21 }
 0x16b   :  { %v2024_v52 = vpop.eup %2023  ;;  %1532 = vst [vmem:[%s2719_s4 + $0x1a0] sm:$0xff] %v2022_v1  ;;  %2043 = vpow2.f32 %v1615_v31 }
 0x16c   :  { %v2026_v3 = vpop.eup %2025  ;;  %1503 = vst [vmem:[%s2719_s4 + $0xb8] sm:$0xff] %v2024_v52  ;;  %2045 = vpow2.f32 %v1647_v62 }
 0x16d   :  { %v2028_v54 = vpop.eup %2027  ;;  %1535 = vst [vmem:[%s2719_s4 + $0x1b8] sm:$0xff] %v2026_v3  ;;  %2047 = vpow2.f32 %v1620_v63 }
 0x16e   :  { %v2030_v14 = vpop.eup %2029  ;;  %1501 = vst [vmem:[%s2719_s4 + $0xa8] sm:$0xff] %v2028_v54  ;;  %2049 = vpow2.f32 %v1652_v43 }
 0x16f   :  { %v2032_v9 = vpop.eup %2031  ;;  %1533 = vst [vmem:[%s2719_s4 + $0x1a8] sm:$0xff] %v2030_v14  ;;  %2051 = vpow2.f32 %v1618_v46 }
 0x170   :  { %v2034_v12 = vpop.eup %2033  ;;  %1506 = vst [vmem:[%s2719_s4 + $0xd0] sm:$0xff] %v2032_v9  ;;  %2053 = vpow2.f32 %v1650_v41 }
 0x171   :  { %v2036_v18 = vpop.eup %2035  ;;  %1538 = vst [vmem:[%s2719_s4 + $0x1d0] sm:$0xff] %v2034_v12  ;;  %2055 = vpow2.f32 %v1621_v8 }
 0x172   :  { %v2038_v19 = vpop.eup %2037  ;;  %1504 = vst [vmem:[%s2719_s4 + $0xc0] sm:$0xff] %v2036_v18  ;;  %2057 = vpow2.f32 %v1653_v15 }
 0x173   :  { %v2040_v16 = vpop.eup %2039  ;;  %1536 = vst [vmem:[%s2719_s4 + $0x1c0] sm:$0xff] %v2038_v19  ;;  %2059 = vpow2.f32 %v1619_v59 }
 0x174   :  { %v2042_v22 = vpop.eup %2041  ;;  %v1315_v25 = vadd.f32 1.0, %v2040_v16  ;;  %2061 = vpow2.f32 %v1651_v17 }
 0x175   :  { %v2044_v6 = vpop.eup %2043  ;;  %v1347_v26 = vadd.f32 1.0, %v2042_v22 }
 0x176   :  { %v2046_v20 = vpop.eup %2045  ;;  %2063 = vrcp.f32 %v1315_v25  ;;  %v1313_v34 = vadd.f32 1.0, %v2044_v6 }
 0x177   :  { %v2048_v21 = vpop.eup %2047  ;;  %2065 = vrcp.f32 %v1347_v26  ;;  %v1345_v29 = vadd.f32 1.0, %v2046_v20 }
 0x178   :  { %v2050_v23 = vpop.eup %2049  ;;  %2067 = vrcp.f32 %v1313_v34  ;;  %v1318_v30 = vadd.f32 1.0, %v2048_v21 }
 0x179   :  { %v2052_v60 = vpop.eup %2051  ;;  %2069 = vrcp.f32 %v1345_v29  ;;  %v1350_v24 = vadd.f32 1.0, %v2050_v23 }
 0x17a   :  { %v2054_v53 = vpop.eup %2053  ;;  %2071 = vrcp.f32 %v1318_v30  ;;  %v1316_v35 = vadd.f32 1.0, %v2052_v60 }
 0x17b   :  { %v2056_v0 = vpop.eup %2055  ;;  %2073 = vrcp.f32 %v1350_v24  ;;  %v1348_v37 = vadd.f32 1.0, %v2054_v53 }
 0x17c   :  { %v2058_v33 = vpop.eup %2057  ;;  %2075 = vrcp.f32 %v1316_v35  ;;  %v1319_v39 = vadd.f32 1.0, %v2056_v0 }
 0x17d   :  { %v2060_v36 = vpop.eup %2059  ;;  %2077 = vrcp.f32 %v1348_v37  ;;  %v1351_v44 = vadd.f32 1.0, %v2058_v33 }
 0x17e   :  { %v2062_v38 = vpop.eup %2061  ;;  %2079 = vrcp.f32 %v1319_v39  ;;  %v1317_v4 = vadd.f32 1.0, %v2060_v36 }
 0x17f   :  { %2081 = vrcp.f32 %v1351_v44  ;;  %v1349_v40 = vadd.f32 1.0, %v2062_v38 }
 0x180   :  { %v2064_v50 = vpop.eup %2063  ;;  %2083 = vrcp.f32 %v1317_v4 }
 0x181   :  { %v2066_v51 = vpop.eup %2065  ;;  %1507 = vst [vmem:[%s2719_s4 + $0xd8] sm:$0xff] %v2064_v50  ;;  %2085 = vrcp.f32 %v1349_v40 }
 0x182   :  { %v2068_v10 = vpop.eup %2067  ;;  %1539 = vst [vmem:[%s2719_s4 + $0x1d8] sm:$0xff] %v2066_v51 }
 0x183   :  { %v2070_v5 = vpop.eup %2069  ;;  %1505 = vst [vmem:[%s2719_s4 + $0xc8] sm:$0xff] %v2068_v10 }
 0x184   :  { %v2072_v57 = vpop.eup %2071  ;;  %1537 = vst [vmem:[%s2719_s4 + $0x1c8] sm:$0xff] %v2070_v5 }
 0x185   :  { %v2074_v27 = vpop.eup %2073  ;;  %1510 = vst [vmem:[%s2719_s4 + $0xf0] sm:$0xff] %v2072_v57 }
 0x186   :  { %v2076_v58 = vpop.eup %2075  ;;  %1542 = vst [vmem:[%s2719_s4 + $0x1f0] sm:$0xff] %v2074_v27 }
 0x187   :  { %v2078_v55 = vpop.eup %2077  ;;  %1508 = vst [vmem:[%s2719_s4 + $0xe0] sm:$0xff] %v2076_v58 }
 0x188   :  { %v2080_v7 = vpop.eup %2079  ;;  %1540 = vst [vmem:[%s2719_s4 + $0x1e0] sm:$0xff] %v2078_v55 }
 0x189   :  { %v2082_v28 = vpop.eup %2081  ;;  %1511 = vst [vmem:[%s2719_s4 + $0xf8] sm:$0xff] %v2080_v7 }
 0x18a   :  { %v2084_v47 = vpop.eup %2083  ;;  %1543 = vst [vmem:[%s2719_s4 + $0x1f8] sm:$0xff] %v2082_v28 }
 0x18b   :  { %v2086_v31 = vpop.eup %2085  ;;  %1509 = vst [vmem:[%s2719_s4 + $0xe8] sm:$0xff] %v2084_v47 }
 0x18c   :  { %1541 = vst [vmem:[%s2719_s4 + $0x1e8] sm:$0xff] %v2086_v31 }

</bundles_post_ra>
